<compile_context>
chip_gen: v6e
topology: v6e:2x2x1
jax: 0.10.0
libtpu: 0.0.40
codegen_flags: <defaults>
</compile_context>

<pallas_src>
import jax
import jax.numpy as jnp
from jax.experimental import pallas as pl
from jax.experimental.pallas import tpu as pltpu


def _pick_block(n):
    """Images per grid step: amortize per-step overhead, keep >= 2 grid steps."""
    for b in (8, 4, 2):
        if n % b == 0 and n // b >= 2:
            return b
    return 1


def net12fcn_forward(x_nchw, params):
    w1, b1, w2, b2, w3, b3 = params          # PyTorch-layout parameters
    N, C, H, W = x_nchw.shape                # (N, 3, 16, 16)
    Ho, Wo = H // 2, W // 2                  # pooled spatial 8 x 8
    P = Ho * Wo                              # 64 pooled positions
    C1 = w1.shape[0]                         # 16 conv1 out channels
    C2 = w2.shape[0]                         # 16 fc out channels
    KH = w2.shape[2]                         # 6
    OS = Ho - KH + 1                         # 3 (fc / output spatial side)
    NO = OS * OS                             # 9 output positions
    K = 32                                   # conv1 contraction: 27 taps + bias + pad

    x = jnp.transpose(x_nchw, (0, 2, 3, 1)).astype(jnp.float32)      # NHWC

    # -------- wrapper glue: conv1 im2col gathered in pool-window order --------
    xpad = jnp.pad(x, ((0, 0), (1, 1), (1, 1), (0, 0)))
    taps = [xpad[:, a:a + H, c:c + W, :] for a in range(3) for c in range(3)]
    cols = jnp.stack(taps, axis=3).reshape(N, H, W, 9 * C)            # (N,16,16,27)
    cols = jnp.concatenate([cols, jnp.ones((N, H, W, 1), jnp.float32)], axis=-1)
    cols = jnp.pad(cols, ((0, 0), (0, 0), (0, 0), (0, K - cols.shape[-1])))
    colsz = jnp.pad(cols, ((0, 0), (1, 1), (1, 1), (0, 0)))           # pool zero-pad
    # 9 pool-window shifts at stride 2; out-of-range positions are all-zero rows
    shifts = jnp.stack(
        [colsz[:, dy:dy + H:2, dx:dx + W:2, :] for dy in range(3) for dx in range(3)],
        axis=1)                                                       # (N,9,8,8,32)
    cols_pool = jnp.transpose(shifts, (0, 1, 4, 2, 3)).reshape(N, 9 * K, P)  # (N,288,64)

    # -------- weight packing --------
    # conv1 weight + bias as one (16, 32) matrix (bias matched to the ones column)
    w1m = jnp.transpose(w1, (0, 2, 3, 1)).reshape(C1, 9 * C)
    w1m = jnp.concatenate([w1m, b1.reshape(C1, 1)], axis=1)
    w1m = jnp.pad(w1m, ((0, 0), (0, K - w1m.shape[-1])))              # (16,32)

    # fc (6x6 conv) weights embedded over the 8x8 pooled grid:
    # w2e[ci, y*8+x, o*16+co] = w2[co, ci, y-oy, x-ox] inside the window, else 0
    w2t = jnp.transpose(w2, (1, 2, 3, 0))                             # (ci,ky,kx,co)
    embs = [jnp.pad(w2t, ((0, 0), (oy, OS - 1 - oy), (ox, OS - 1 - ox), (0, 0)))
            for oy in range(OS) for ox in range(OS)]
    w2e = jnp.stack(embs, axis=0)                                     # (9,16,8,8,16)
    w2e = jnp.transpose(w2e, (1, 2, 3, 0, 4)).reshape(C1, P, NO * C2)  # (16,64,144)
    b2t = jnp.tile(b2.reshape(1, 1, C2), (1, NO, 1)).reshape(1, NO * C2)

    # 1x1 output conv as a (144, 9) selector: w3e[o*16+co, o'] = w3[co] * (o == o')
    w3v = w3.reshape(C2)
    w3e = (jnp.eye(NO, dtype=jnp.float32)[:, None, :] * w3v[None, :, None]
           ).reshape(NO * C2, NO)                                     # (144,9)
    b3m = b3.reshape(1, 1)

    # -------- fused Pallas kernel --------
    B = _pick_block(N)
    G = N // B

    def kernel(cols_ref, w1_ref, w2e_ref, b2_ref, w3e_ref, b3_ref, o_ref):
        w1v = w1_ref[...]                                             # (16,32)
        pooled = []
        for b in range(B):
            m = None
            for s in range(9):                                        # pool shifts
                cs = cols_ref[b, K * s:K * (s + 1), :]                # (32,64)
                v = jnp.dot(w1v, cs, preferred_element_type=jnp.float32)  # conv1+bias
                m = v if m is None else jnp.maximum(m, v)             # maxpool
            pooled.append(jnp.maximum(m, 0.0))                        # ReLU -> (16,64)
        # fc conv (6x6) as 16 accumulated matmuls over input channels; the
        # maxpool was reduced BEFORE any patch duplication.
        acc = None
        for ci in range(C1):
            if B == 1:
                lhs = pooled[0][ci:ci + 1, :]                         # (1,64)
            else:
                lhs = jnp.concatenate([p[ci:ci + 1, :] for p in pooled], axis=0)
            d = jnp.dot(lhs, w2e_ref[ci], preferred_element_type=jnp.float32)
            acc = d if acc is None else acc + d                       # (B,144)
        h = jnp.maximum(acc + b2_ref[...], 0.0)                       # fc bias + ReLU
        y = jnp.dot(h, w3e_ref[...], preferred_element_type=jnp.float32) + b3_ref[...]
        o_ref[...] = 1.0 / (1.0 + jnp.exp(-y))                        # sigmoid (B,9)

    out = pl.pallas_call(
        kernel,
        out_shape=jax.ShapeDtypeStruct((G, B, NO), jnp.float32),
        grid=(G,),
        in_specs=[
            pl.BlockSpec((B, 9 * K, P), lambda i: (i, 0, 0)),
            pl.BlockSpec((C1, K), lambda i: (0, 0)),
            pl.BlockSpec((C1, P, NO * C2), lambda i: (0, 0, 0)),
            pl.BlockSpec((1, NO * C2), lambda i: (0, 0)),
            pl.BlockSpec((NO * C2, NO), lambda i: (0, 0)),
            pl.BlockSpec((1, 1), lambda i: (0, 0)),
        ],
        out_specs=pl.BlockSpec((None, B, NO), lambda i: (i, 0, 0)),
        compiler_params=pltpu.CompilerParams(dimension_semantics=("parallel",)),
    )(cols_pool, w1m, w2e, b2t, w3e, b3m)

    # (G, B, 9) -> NCHW (N, 1, 3, 3)
    return out.reshape(N, OS, OS)[:, None, :, :]


# ------------------------- pure-JAX reference check -------------------------

def ref_forward(x_nchw, params):
    w1, b1, w2, b2, w3, b3 = params
    x = jnp.transpose(x_nchw, (0, 2, 3, 1)).astype(jnp.float32)
    dn = ("NHWC", "HWIO", "NHWC")
    h = jax.lax.conv_general_dilated(x, jnp.transpose(w1, (2, 3, 1, 0)), (1, 1),
                                     ((1, 1), (1, 1)), dimension_numbers=dn) + b1
    h = jax.lax.reduce_window(h, -jnp.inf, jax.lax.max, (1, 3, 3, 1), (1, 2, 2, 1),
                              ((0, 0), (1, 1), (1, 1), (0, 0)))
    h = jnp.maximum(h, 0.0)
    h = jax.lax.conv_general_dilated(h, jnp.transpose(w2, (2, 3, 1, 0)), (1, 1),
                                     "VALID", dimension_numbers=dn) + b2
    h = jnp.maximum(h, 0.0)
    h = jax.lax.conv_general_dilated(h, jnp.transpose(w3, (2, 3, 1, 0)), (1, 1),
                                     "VALID", dimension_numbers=dn) + b3
    h = jax.nn.sigmoid(h)
    return jnp.transpose(h, (0, 3, 1, 2))


# ----------------------------------- main -----------------------------------

if __name__ == "__main__":
    key = jax.random.PRNGKey(0)
    kx, k1, k2, k3, k4, k5, k6 = jax.random.split(key, 7)

    # input: NCHW (batch=2, channels=3, 16x16)
    x = jax.random.normal(kx, (2, 3, 16, 16), dtype=jnp.float32)

    # deterministic parameters with PyTorch shapes
    params = (
        0.10 * jax.random.normal(k1, (16, 3, 3, 3), dtype=jnp.float32),   # conv.weight
        0.05 * jax.random.normal(k2, (16,), dtype=jnp.float32),           # conv.bias
        0.05 * jax.random.normal(k3, (16, 16, 6, 6), dtype=jnp.float32),  # fc.weight
        0.05 * jax.random.normal(k4, (16,), dtype=jnp.float32),           # fc.bias
        0.10 * jax.random.normal(k5, (1, 16, 1, 1), dtype=jnp.float32),   # output.weight
        0.05 * jax.random.normal(k6, (1,), dtype=jnp.float32),            # output.bias
    )

    fwd = jax.jit(net12fcn_forward)
    out = jax.block_until_ready(fwd(x, params))
    assert out.shape == (2, 1, 3, 3), out.shape

    ref = jax.block_until_ready(ref_forward(x, params))
    assert jnp.allclose(out, ref, rtol=1e-4, atol=1e-5), (
        "mismatch vs reference", float(jnp.max(jnp.abs(out - ref))))

    print("KERNEL_OK")
</pallas_src>

<mosaic_0001>
module attributes {stable_mosaic.version = 11 : i64} {
  func.func @kernel(%arg0: i32, %arg1: memref<1x288x64xf32, #tpu.memory_space<vmem>>, %arg2: memref<16x32xf32, #tpu.memory_space<vmem>>, %arg3: memref<16x64x144xf32, #tpu.memory_space<vmem>>, %arg4: memref<1x144xf32, #tpu.memory_space<vmem>>, %arg5: memref<144x9xf32, #tpu.memory_space<vmem>>, %arg6: memref<1x1xf32, #tpu.memory_space<vmem>>, %arg7: memref<1x1x9xf32, #tpu.memory_space<vmem>>) attributes {dimension_semantics = [#tpu.dimension_semantics<parallel>], iteration_bounds = array<i64: 2>, scalar_prefetch = 0 : i64, scratch_operands = 0 : i64, tpu.core_type = #tpu.core_type<tc>, window_params = [{transform_indices = @transform_0, window_bounds = array<i64: 1, 288, 64>}, {pipeline_mode = #tpu.pipeline_mode<synchronous>, transform_indices = @transform_1, window_bounds = array<i64: 16, 32>}, {pipeline_mode = #tpu.pipeline_mode<synchronous>, transform_indices = @transform_2, window_bounds = array<i64: 16, 64, 144>}, {pipeline_mode = #tpu.pipeline_mode<synchronous>, transform_indices = @transform_3, window_bounds = array<i64: 1, 144>}, {pipeline_mode = #tpu.pipeline_mode<synchronous>, transform_indices = @transform_4, window_bounds = array<i64: 144, 9>}, {pipeline_mode = #tpu.pipeline_mode<synchronous>, transform_indices = @transform_5, window_bounds = array<i64: 1, 1>}, {transform_indices = @transform_6, window_bounds = array<i64: 1, 1, 9>}]} {
    %c0 = arith.constant 0 : index
    %c0_0 = arith.constant 0 : index
    %0 = vector.load %arg2[%c0, %c0_0] : memref<16x32xf32, #tpu.memory_space<vmem>>, vector<16x32xf32>
    %c0_1 = arith.constant 0 : index
    %c0_2 = arith.constant 0 : index
    %c0_3 = arith.constant 0 : index
    %1 = vector.load %arg1[%c0_1, %c0_2, %c0_3] : memref<1x288x64xf32, #tpu.memory_space<vmem>>, vector<1x32x64xf32>
    %2 = vector.shape_cast %1 : vector<1x32x64xf32> to vector<32x64xf32>
    %cst = arith.constant dense<0.000000e+00> : vector<16x64xf32>
    %3 = tpu.matmul %0, %2, %cst {dimension_numbers = #tpu.dot_dimension_numbers<[1], [0], [0], [1], [0, 0, 1, 1], [], []>} : vector<16x32xf32>, vector<32x64xf32>, vector<16x64xf32> -> vector<16x64xf32>
    %c0_4 = arith.constant 0 : index
    %c32 = arith.constant 32 : index
    %c0_5 = arith.constant 0 : index
    %4 = vector.load %arg1[%c0_4, %c32, %c0_5] : memref<1x288x64xf32, #tpu.memory_space<vmem>>, vector<1x32x64xf32>
    %5 = vector.shape_cast %4 : vector<1x32x64xf32> to vector<32x64xf32>
    %cst_6 = arith.constant dense<0.000000e+00> : vector<16x64xf32>
    %6 = tpu.matmul %0, %5, %cst_6 {dimension_numbers = #tpu.dot_dimension_numbers<[1], [0], [0], [1], [0, 0, 1, 1], [], []>} : vector<16x32xf32>, vector<32x64xf32>, vector<16x64xf32> -> vector<16x64xf32>
    %7 = arith.maximumf %3, %6 : vector<16x64xf32>
    %c0_7 = arith.constant 0 : index
    %c64 = arith.constant 64 : index
    %c0_8 = arith.constant 0 : index
    %8 = vector.load %arg1[%c0_7, %c64, %c0_8] : memref<1x288x64xf32, #tpu.memory_space<vmem>>, vector<1x32x64xf32>
    %9 = vector.shape_cast %8 : vector<1x32x64xf32> to vector<32x64xf32>
    %cst_9 = arith.constant dense<0.000000e+00> : vector<16x64xf32>
    %10 = tpu.matmul %0, %9, %cst_9 {dimension_numbers = #tpu.dot_dimension_numbers<[1], [0], [0], [1], [0, 0, 1, 1], [], []>} : vector<16x32xf32>, vector<32x64xf32>, vector<16x64xf32> -> vector<16x64xf32>
    %11 = arith.maximumf %7, %10 : vector<16x64xf32>
    %c0_10 = arith.constant 0 : index
    %c96 = arith.constant 96 : index
    %c0_11 = arith.constant 0 : index
    %12 = vector.load %arg1[%c0_10, %c96, %c0_11] : memref<1x288x64xf32, #tpu.memory_space<vmem>>, vector<1x32x64xf32>
    %13 = vector.shape_cast %12 : vector<1x32x64xf32> to vector<32x64xf32>
    %cst_12 = arith.constant dense<0.000000e+00> : vector<16x64xf32>
    %14 = tpu.matmul %0, %13, %cst_12 {dimension_numbers = #tpu.dot_dimension_numbers<[1], [0], [0], [1], [0, 0, 1, 1], [], []>} : vector<16x32xf32>, vector<32x64xf32>, vector<16x64xf32> -> vector<16x64xf32>
    %15 = arith.maximumf %11, %14 : vector<16x64xf32>
    %c0_13 = arith.constant 0 : index
    %c128 = arith.constant 128 : index
    %c0_14 = arith.constant 0 : index
    %16 = vector.load %arg1[%c0_13, %c128, %c0_14] : memref<1x288x64xf32, #tpu.memory_space<vmem>>, vector<1x32x64xf32>
    %17 = vector.shape_cast %16 : vector<1x32x64xf32> to vector<32x64xf32>
    %cst_15 = arith.constant dense<0.000000e+00> : vector<16x64xf32>
    %18 = tpu.matmul %0, %17, %cst_15 {dimension_numbers = #tpu.dot_dimension_numbers<[1], [0], [0], [1], [0, 0, 1, 1], [], []>} : vector<16x32xf32>, vector<32x64xf32>, vector<16x64xf32> -> vector<16x64xf32>
    %19 = arith.maximumf %15, %18 : vector<16x64xf32>
    %c0_16 = arith.constant 0 : index
    %c160 = arith.constant 160 : index
    %c0_17 = arith.constant 0 : index
    %20 = vector.load %arg1[%c0_16, %c160, %c0_17] : memref<1x288x64xf32, #tpu.memory_space<vmem>>, vector<1x32x64xf32>
    %21 = vector.shape_cast %20 : vector<1x32x64xf32> to vector<32x64xf32>
    %cst_18 = arith.constant dense<0.000000e+00> : vector<16x64xf32>
    %22 = tpu.matmul %0, %21, %cst_18 {dimension_numbers = #tpu.dot_dimension_numbers<[1], [0], [0], [1], [0, 0, 1, 1], [], []>} : vector<16x32xf32>, vector<32x64xf32>, vector<16x64xf32> -> vector<16x64xf32>
    %23 = arith.maximumf %19, %22 : vector<16x64xf32>
    %c0_19 = arith.constant 0 : index
    %c192 = arith.constant 192 : index
    %c0_20 = arith.constant 0 : index
    %24 = vector.load %arg1[%c0_19, %c192, %c0_20] : memref<1x288x64xf32, #tpu.memory_space<vmem>>, vector<1x32x64xf32>
    %25 = vector.shape_cast %24 : vector<1x32x64xf32> to vector<32x64xf32>
    %cst_21 = arith.constant dense<0.000000e+00> : vector<16x64xf32>
    %26 = tpu.matmul %0, %25, %cst_21 {dimension_numbers = #tpu.dot_dimension_numbers<[1], [0], [0], [1], [0, 0, 1, 1], [], []>} : vector<16x32xf32>, vector<32x64xf32>, vector<16x64xf32> -> vector<16x64xf32>
    %27 = arith.maximumf %23, %26 : vector<16x64xf32>
    %c0_22 = arith.constant 0 : index
    %c224 = arith.constant 224 : index
    %c0_23 = arith.constant 0 : index
    %28 = vector.load %arg1[%c0_22, %c224, %c0_23] : memref<1x288x64xf32, #tpu.memory_space<vmem>>, vector<1x32x64xf32>
    %29 = vector.shape_cast %28 : vector<1x32x64xf32> to vector<32x64xf32>
    %cst_24 = arith.constant dense<0.000000e+00> : vector<16x64xf32>
    %30 = tpu.matmul %0, %29, %cst_24 {dimension_numbers = #tpu.dot_dimension_numbers<[1], [0], [0], [1], [0, 0, 1, 1], [], []>} : vector<16x32xf32>, vector<32x64xf32>, vector<16x64xf32> -> vector<16x64xf32>
    %31 = arith.maximumf %27, %30 : vector<16x64xf32>
    %c0_25 = arith.constant 0 : index
    %c256 = arith.constant 256 : index
    %c0_26 = arith.constant 0 : index
    %32 = vector.load %arg1[%c0_25, %c256, %c0_26] : memref<1x288x64xf32, #tpu.memory_space<vmem>>, vector<1x32x64xf32>
    %33 = vector.shape_cast %32 : vector<1x32x64xf32> to vector<32x64xf32>
    %cst_27 = arith.constant dense<0.000000e+00> : vector<16x64xf32>
    %34 = tpu.matmul %0, %33, %cst_27 {dimension_numbers = #tpu.dot_dimension_numbers<[1], [0], [0], [1], [0, 0, 1, 1], [], []>} : vector<16x32xf32>, vector<32x64xf32>, vector<16x64xf32> -> vector<16x64xf32>
    %35 = arith.maximumf %31, %34 : vector<16x64xf32>
    %cst_28 = arith.constant 0.000000e+00 : f32
    %36 = vector.broadcast %cst_28 : f32 to vector<16x64xf32>
    %37 = arith.maximumf %35, %36 : vector<16x64xf32>
    %38 = vector.extract_strided_slice %37 {offsets = [0, 0], sizes = [1, 64], strides = [1, 1]} : vector<16x64xf32> to vector<1x64xf32>
    %c0_29 = arith.constant 0 : index
    %c0_30 = arith.constant 0 : index
    %c0_31 = arith.constant 0 : index
    %39 = vector.load %arg3[%c0_29, %c0_30, %c0_31] : memref<16x64x144xf32, #tpu.memory_space<vmem>>, vector<1x64x144xf32>
    %40 = vector.shape_cast %39 : vector<1x64x144xf32> to vector<64x144xf32>
    %cst_32 = arith.constant dense<0.000000e+00> : vector<1x144xf32>
    %41 = tpu.matmul %38, %40, %cst_32 {dimension_numbers = #tpu.dot_dimension_numbers<[1], [0], [0], [1], [0, 0, 1, 1], [], []>} : vector<1x64xf32>, vector<64x144xf32>, vector<1x144xf32> -> vector<1x144xf32>
    %42 = vector.extract_strided_slice %37 {offsets = [1, 0], sizes = [1, 64], strides = [1, 1]} : vector<16x64xf32> to vector<1x64xf32>
    %c1 = arith.constant 1 : index
    %c0_33 = arith.constant 0 : index
    %c0_34 = arith.constant 0 : index
    %43 = vector.load %arg3[%c1, %c0_33, %c0_34] : memref<16x64x144xf32, #tpu.memory_space<vmem>>, vector<1x64x144xf32>
    %44 = vector.shape_cast %43 : vector<1x64x144xf32> to vector<64x144xf32>
    %cst_35 = arith.constant dense<0.000000e+00> : vector<1x144xf32>
    %45 = tpu.matmul %42, %44, %cst_35 {dimension_numbers = #tpu.dot_dimension_numbers<[1], [0], [0], [1], [0, 0, 1, 1], [], []>} : vector<1x64xf32>, vector<64x144xf32>, vector<1x144xf32> -> vector<1x144xf32>
    %46 = arith.addf %41, %45 : vector<1x144xf32>
    %47 = vector.extract_strided_slice %37 {offsets = [2, 0], sizes = [1, 64], strides = [1, 1]} : vector<16x64xf32> to vector<1x64xf32>
    %c2 = arith.constant 2 : index
    %c0_36 = arith.constant 0 : index
    %c0_37 = arith.constant 0 : index
    %48 = vector.load %arg3[%c2, %c0_36, %c0_37] : memref<16x64x144xf32, #tpu.memory_space<vmem>>, vector<1x64x144xf32>
    %49 = vector.shape_cast %48 : vector<1x64x144xf32> to vector<64x144xf32>
    %cst_38 = arith.constant dense<0.000000e+00> : vector<1x144xf32>
    %50 = tpu.matmul %47, %49, %cst_38 {dimension_numbers = #tpu.dot_dimension_numbers<[1], [0], [0], [1], [0, 0, 1, 1], [], []>} : vector<1x64xf32>, vector<64x144xf32>, vector<1x144xf32> -> vector<1x144xf32>
    %51 = arith.addf %46, %50 : vector<1x144xf32>
    %52 = vector.extract_strided_slice %37 {offsets = [3, 0], sizes = [1, 64], strides = [1, 1]} : vector<16x64xf32> to vector<1x64xf32>
    %c3 = arith.constant 3 : index
    %c0_39 = arith.constant 0 : index
    %c0_40 = arith.constant 0 : index
    %53 = vector.load %arg3[%c3, %c0_39, %c0_40] : memref<16x64x144xf32, #tpu.memory_space<vmem>>, vector<1x64x144xf32>
    %54 = vector.shape_cast %53 : vector<1x64x144xf32> to vector<64x144xf32>
    %cst_41 = arith.constant dense<0.000000e+00> : vector<1x144xf32>
    %55 = tpu.matmul %52, %54, %cst_41 {dimension_numbers = #tpu.dot_dimension_numbers<[1], [0], [0], [1], [0, 0, 1, 1], [], []>} : vector<1x64xf32>, vector<64x144xf32>, vector<1x144xf32> -> vector<1x144xf32>
    %56 = arith.addf %51, %55 : vector<1x144xf32>
    %57 = vector.extract_strided_slice %37 {offsets = [4, 0], sizes = [1, 64], strides = [1, 1]} : vector<16x64xf32> to vector<1x64xf32>
    %c4 = arith.constant 4 : index
    %c0_42 = arith.constant 0 : index
    %c0_43 = arith.constant 0 : index
    %58 = vector.load %arg3[%c4, %c0_42, %c0_43] : memref<16x64x144xf32, #tpu.memory_space<vmem>>, vector<1x64x144xf32>
    %59 = vector.shape_cast %58 : vector<1x64x144xf32> to vector<64x144xf32>
    %cst_44 = arith.constant dense<0.000000e+00> : vector<1x144xf32>
    %60 = tpu.matmul %57, %59, %cst_44 {dimension_numbers = #tpu.dot_dimension_numbers<[1], [0], [0], [1], [0, 0, 1, 1], [], []>} : vector<1x64xf32>, vector<64x144xf32>, vector<1x144xf32> -> vector<1x144xf32>
    %61 = arith.addf %56, %60 : vector<1x144xf32>
    %62 = vector.extract_strided_slice %37 {offsets = [5, 0], sizes = [1, 64], strides = [1, 1]} : vector<16x64xf32> to vector<1x64xf32>
    %c5 = arith.constant 5 : index
    %c0_45 = arith.constant 0 : index
    %c0_46 = arith.constant 0 : index
    %63 = vector.load %arg3[%c5, %c0_45, %c0_46] : memref<16x64x144xf32, #tpu.memory_space<vmem>>, vector<1x64x144xf32>
    %64 = vector.shape_cast %63 : vector<1x64x144xf32> to vector<64x144xf32>
    %cst_47 = arith.constant dense<0.000000e+00> : vector<1x144xf32>
    %65 = tpu.matmul %62, %64, %cst_47 {dimension_numbers = #tpu.dot_dimension_numbers<[1], [0], [0], [1], [0, 0, 1, 1], [], []>} : vector<1x64xf32>, vector<64x144xf32>, vector<1x144xf32> -> vector<1x144xf32>
    %66 = arith.addf %61, %65 : vector<1x144xf32>
    %67 = vector.extract_strided_slice %37 {offsets = [6, 0], sizes = [1, 64], strides = [1, 1]} : vector<16x64xf32> to vector<1x64xf32>
    %c6 = arith.constant 6 : index
    %c0_48 = arith.constant 0 : index
    %c0_49 = arith.constant 0 : index
    %68 = vector.load %arg3[%c6, %c0_48, %c0_49] : memref<16x64x144xf32, #tpu.memory_space<vmem>>, vector<1x64x144xf32>
    %69 = vector.shape_cast %68 : vector<1x64x144xf32> to vector<64x144xf32>
    %cst_50 = arith.constant dense<0.000000e+00> : vector<1x144xf32>
    %70 = tpu.matmul %67, %69, %cst_50 {dimension_numbers = #tpu.dot_dimension_numbers<[1], [0], [0], [1], [0, 0, 1, 1], [], []>} : vector<1x64xf32>, vector<64x144xf32>, vector<1x144xf32> -> vector<1x144xf32>
    %71 = arith.addf %66, %70 : vector<1x144xf32>
    %72 = vector.extract_strided_slice %37 {offsets = [7, 0], sizes = [1, 64], strides = [1, 1]} : vector<16x64xf32> to vector<1x64xf32>
    %c7 = arith.constant 7 : index
    %c0_51 = arith.constant 0 : index
    %c0_52 = arith.constant 0 : index
    %73 = vector.load %arg3[%c7, %c0_51, %c0_52] : memref<16x64x144xf32, #tpu.memory_space<vmem>>, vector<1x64x144xf32>
    %74 = vector.shape_cast %73 : vector<1x64x144xf32> to vector<64x144xf32>
    %cst_53 = arith.constant dense<0.000000e+00> : vector<1x144xf32>
    %75 = tpu.matmul %72, %74, %cst_53 {dimension_numbers = #tpu.dot_dimension_numbers<[1], [0], [0], [1], [0, 0, 1, 1], [], []>} : vector<1x64xf32>, vector<64x144xf32>, vector<1x144xf32> -> vector<1x144xf32>
    %76 = arith.addf %71, %75 : vector<1x144xf32>
    %77 = vector.extract_strided_slice %37 {offsets = [8, 0], sizes = [1, 64], strides = [1, 1]} : vector<16x64xf32> to vector<1x64xf32>
    %c8 = arith.constant 8 : index
    %c0_54 = arith.constant 0 : index
    %c0_55 = arith.constant 0 : index
    %78 = vector.load %arg3[%c8, %c0_54, %c0_55] : memref<16x64x144xf32, #tpu.memory_space<vmem>>, vector<1x64x144xf32>
    %79 = vector.shape_cast %78 : vector<1x64x144xf32> to vector<64x144xf32>
    %cst_56 = arith.constant dense<0.000000e+00> : vector<1x144xf32>
    %80 = tpu.matmul %77, %79, %cst_56 {dimension_numbers = #tpu.dot_dimension_numbers<[1], [0], [0], [1], [0, 0, 1, 1], [], []>} : vector<1x64xf32>, vector<64x144xf32>, vector<1x144xf32> -> vector<1x144xf32>
    %81 = arith.addf %76, %80 : vector<1x144xf32>
    %82 = vector.extract_strided_slice %37 {offsets = [9, 0], sizes = [1, 64], strides = [1, 1]} : vector<16x64xf32> to vector<1x64xf32>
    %c9 = arith.constant 9 : index
    %c0_57 = arith.constant 0 : index
    %c0_58 = arith.constant 0 : index
    %83 = vector.load %arg3[%c9, %c0_57, %c0_58] : memref<16x64x144xf32, #tpu.memory_space<vmem>>, vector<1x64x144xf32>
    %84 = vector.shape_cast %83 : vector<1x64x144xf32> to vector<64x144xf32>
    %cst_59 = arith.constant dense<0.000000e+00> : vector<1x144xf32>
    %85 = tpu.matmul %82, %84, %cst_59 {dimension_numbers = #tpu.dot_dimension_numbers<[1], [0], [0], [1], [0, 0, 1, 1], [], []>} : vector<1x64xf32>, vector<64x144xf32>, vector<1x144xf32> -> vector<1x144xf32>
    %86 = arith.addf %81, %85 : vector<1x144xf32>
    %87 = vector.extract_strided_slice %37 {offsets = [10, 0], sizes = [1, 64], strides = [1, 1]} : vector<16x64xf32> to vector<1x64xf32>
    %c10 = arith.constant 10 : index
    %c0_60 = arith.constant 0 : index
    %c0_61 = arith.constant 0 : index
    %88 = vector.load %arg3[%c10, %c0_60, %c0_61] : memref<16x64x144xf32, #tpu.memory_space<vmem>>, vector<1x64x144xf32>
    %89 = vector.shape_cast %88 : vector<1x64x144xf32> to vector<64x144xf32>
    %cst_62 = arith.constant dense<0.000000e+00> : vector<1x144xf32>
    %90 = tpu.matmul %87, %89, %cst_62 {dimension_numbers = #tpu.dot_dimension_numbers<[1], [0], [0], [1], [0, 0, 1, 1], [], []>} : vector<1x64xf32>, vector<64x144xf32>, vector<1x144xf32> -> vector<1x144xf32>
    %91 = arith.addf %86, %90 : vector<1x144xf32>
    %92 = vector.extract_strided_slice %37 {offsets = [11, 0], sizes = [1, 64], strides = [1, 1]} : vector<16x64xf32> to vector<1x64xf32>
    %c11 = arith.constant 11 : index
    %c0_63 = arith.constant 0 : index
    %c0_64 = arith.constant 0 : index
    %93 = vector.load %arg3[%c11, %c0_63, %c0_64] : memref<16x64x144xf32, #tpu.memory_space<vmem>>, vector<1x64x144xf32>
    %94 = vector.shape_cast %93 : vector<1x64x144xf32> to vector<64x144xf32>
    %cst_65 = arith.constant dense<0.000000e+00> : vector<1x144xf32>
    %95 = tpu.matmul %92, %94, %cst_65 {dimension_numbers = #tpu.dot_dimension_numbers<[1], [0], [0], [1], [0, 0, 1, 1], [], []>} : vector<1x64xf32>, vector<64x144xf32>, vector<1x144xf32> -> vector<1x144xf32>
    %96 = arith.addf %91, %95 : vector<1x144xf32>
    %97 = vector.extract_strided_slice %37 {offsets = [12, 0], sizes = [1, 64], strides = [1, 1]} : vector<16x64xf32> to vector<1x64xf32>
    %c12 = arith.constant 12 : index
    %c0_66 = arith.constant 0 : index
    %c0_67 = arith.constant 0 : index
    %98 = vector.load %arg3[%c12, %c0_66, %c0_67] : memref<16x64x144xf32, #tpu.memory_space<vmem>>, vector<1x64x144xf32>
    %99 = vector.shape_cast %98 : vector<1x64x144xf32> to vector<64x144xf32>
    %cst_68 = arith.constant dense<0.000000e+00> : vector<1x144xf32>
    %100 = tpu.matmul %97, %99, %cst_68 {dimension_numbers = #tpu.dot_dimension_numbers<[1], [0], [0], [1], [0, 0, 1, 1], [], []>} : vector<1x64xf32>, vector<64x144xf32>, vector<1x144xf32> -> vector<1x144xf32>
    %101 = arith.addf %96, %100 : vector<1x144xf32>
    %102 = vector.extract_strided_slice %37 {offsets = [13, 0], sizes = [1, 64], strides = [1, 1]} : vector<16x64xf32> to vector<1x64xf32>
    %c13 = arith.constant 13 : index
    %c0_69 = arith.constant 0 : index
    %c0_70 = arith.constant 0 : index
    %103 = vector.load %arg3[%c13, %c0_69, %c0_70] : memref<16x64x144xf32, #tpu.memory_space<vmem>>, vector<1x64x144xf32>
    %104 = vector.shape_cast %103 : vector<1x64x144xf32> to vector<64x144xf32>
    %cst_71 = arith.constant dense<0.000000e+00> : vector<1x144xf32>
    %105 = tpu.matmul %102, %104, %cst_71 {dimension_numbers = #tpu.dot_dimension_numbers<[1], [0], [0], [1], [0, 0, 1, 1], [], []>} : vector<1x64xf32>, vector<64x144xf32>, vector<1x144xf32> -> vector<1x144xf32>
    %106 = arith.addf %101, %105 : vector<1x144xf32>
    %107 = vector.extract_strided_slice %37 {offsets = [14, 0], sizes = [1, 64], strides = [1, 1]} : vector<16x64xf32> to vector<1x64xf32>
    %c14 = arith.constant 14 : index
    %c0_72 = arith.constant 0 : index
    %c0_73 = arith.constant 0 : index
    %108 = vector.load %arg3[%c14, %c0_72, %c0_73] : memref<16x64x144xf32, #tpu.memory_space<vmem>>, vector<1x64x144xf32>
    %109 = vector.shape_cast %108 : vector<1x64x144xf32> to vector<64x144xf32>
    %cst_74 = arith.constant dense<0.000000e+00> : vector<1x144xf32>
    %110 = tpu.matmul %107, %109, %cst_74 {dimension_numbers = #tpu.dot_dimension_numbers<[1], [0], [0], [1], [0, 0, 1, 1], [], []>} : vector<1x64xf32>, vector<64x144xf32>, vector<1x144xf32> -> vector<1x144xf32>
    %111 = arith.addf %106, %110 : vector<1x144xf32>
    %112 = vector.extract_strided_slice %37 {offsets = [15, 0], sizes = [1, 64], strides = [1, 1]} : vector<16x64xf32> to vector<1x64xf32>
    %c15 = arith.constant 15 : index
    %c0_75 = arith.constant 0 : index
    %c0_76 = arith.constant 0 : index
    %113 = vector.load %arg3[%c15, %c0_75, %c0_76] : memref<16x64x144xf32, #tpu.memory_space<vmem>>, vector<1x64x144xf32>
    %114 = vector.shape_cast %113 : vector<1x64x144xf32> to vector<64x144xf32>
    %cst_77 = arith.constant dense<0.000000e+00> : vector<1x144xf32>
    %115 = tpu.matmul %112, %114, %cst_77 {dimension_numbers = #tpu.dot_dimension_numbers<[1], [0], [0], [1], [0, 0, 1, 1], [], []>} : vector<1x64xf32>, vector<64x144xf32>, vector<1x144xf32> -> vector<1x144xf32>
    %116 = arith.addf %111, %115 : vector<1x144xf32>
    %c0_78 = arith.constant 0 : index
    %c0_79 = arith.constant 0 : index
    %117 = vector.load %arg4[%c0_78, %c0_79] : memref<1x144xf32, #tpu.memory_space<vmem>>, vector<1x144xf32>
    %118 = arith.addf %116, %117 : vector<1x144xf32>
    %cst_80 = arith.constant 0.000000e+00 : f32
    %119 = vector.broadcast %cst_80 : f32 to vector<1x144xf32>
    %120 = arith.maximumf %118, %119 : vector<1x144xf32>
    %c0_81 = arith.constant 0 : index
    %c0_82 = arith.constant 0 : index
    %121 = vector.load %arg5[%c0_81, %c0_82] : memref<144x9xf32, #tpu.memory_space<vmem>>, vector<144x9xf32>
    %cst_83 = arith.constant dense<0.000000e+00> : vector<1x9xf32>
    %122 = tpu.matmul %120, %121, %cst_83 {dimension_numbers = #tpu.dot_dimension_numbers<[1], [0], [0], [1], [0, 0, 1, 1], [], []>} : vector<1x144xf32>, vector<144x9xf32>, vector<1x9xf32> -> vector<1x9xf32>
    %c0_84 = arith.constant 0 : index
    %c0_85 = arith.constant 0 : index
    %123 = vector.load %arg6[%c0_84, %c0_85] : memref<1x1xf32, #tpu.memory_space<vmem>>, vector<1x1xf32>
    %124 = vector.broadcast %123 : vector<1x1xf32> to vector<1x9xf32>
    %125 = arith.addf %122, %124 : vector<1x9xf32>
    %cst_86 = arith.constant 0.000000e+00 : f32
    %126 = vector.broadcast %cst_86 : f32 to vector<1x9xf32>
    %127 = arith.subf %126, %125 : vector<1x9xf32>
    %128 = math.exp %127 : vector<1x9xf32>
    %cst_87 = arith.constant 1.000000e+00 : f32
    %129 = vector.broadcast %cst_87 : f32 to vector<1x9xf32>
    %130 = arith.addf %129, %128 : vector<1x9xf32>
    %cst_88 = arith.constant 1.000000e+00 : f32
    %131 = vector.broadcast %cst_88 : f32 to vector<1x9xf32>
    %132 = arith.divf %131, %130 : vector<1x9xf32>
    %c0_89 = arith.constant 0 : index
    %c0_90 = arith.constant 0 : index
    %c0_91 = arith.constant 0 : index
    %133 = vector.load %arg7[%c0_89, %c0_90, %c0_91] : memref<1x1x9xf32, #tpu.memory_space<vmem>>, vector<1x1x9xf32>
    %134 = vector.shape_cast %133 : vector<1x1x9xf32> to vector<1x9xf32>
    %135 = vector.shape_cast %132 : vector<1x9xf32> to vector<1x1x9xf32>
    tpu.vector_store %arg7[%c0_89, %c0_90, %c0_91], %135 {strides = array<i32>} : memref<1x1x9xf32, #tpu.memory_space<vmem>>, vector<1x1x9xf32>,
    return
  }
  func.func @transform_0(%arg0: i32) -> (i32, i32, i32) {
    %c0_i32 = arith.constant 0 : i32
    %c0_i32_0 = arith.constant 0 : i32
    %c0_i32_1 = arith.constant 0 : i32
    return %arg0, %c0_i32, %c0_i32_0 : i32, i32, i32
  }
  func.func @transform_1(%arg0: i32) -> (i32, i32) {
    %c0_i32 = arith.constant 0 : i32
    %c0_i32_0 = arith.constant 0 : i32
    %c0_i32_1 = arith.constant 0 : i32
    return %c0_i32, %c0_i32_0 : i32, i32
  }
  func.func @transform_2(%arg0: i32) -> (i32, i32, i32) {
    %c0_i32 = arith.constant 0 : i32
    %c0_i32_0 = arith.constant 0 : i32
    %c0_i32_1 = arith.constant 0 : i32
    %c0_i32_2 = arith.constant 0 : i32
    return %c0_i32, %c0_i32_0, %c0_i32_1 : i32, i32, i32
  }
  func.func @transform_3(%arg0: i32) -> (i32, i32) {
    %c0_i32 = arith.constant 0 : i32
    %c0_i32_0 = arith.constant 0 : i32
    %c0_i32_1 = arith.constant 0 : i32
    return %c0_i32, %c0_i32_0 : i32, i32
  }
  func.func @transform_4(%arg0: i32) -> (i32, i32) {
    %c0_i32 = arith.constant 0 : i32
    %c0_i32_0 = arith.constant 0 : i32
    %c0_i32_1 = arith.constant 0 : i32
    return %c0_i32, %c0_i32_0 : i32, i32
  }
  func.func @transform_5(%arg0: i32) -> (i32, i32) {
    %c0_i32 = arith.constant 0 : i32
    %c0_i32_0 = arith.constant 0 : i32
    %c0_i32_1 = arith.constant 0 : i32
    return %c0_i32, %c0_i32_0 : i32, i32
  }
  func.func @transform_6(%arg0: i32) -> (i32, i32, i32) {
    %c0_i32 = arith.constant 0 : i32
    %c0_i32_0 = arith.constant 0 : i32
    %c0_i32_1 = arith.constant 0 : i32
    return %arg0, %c0_i32, %c0_i32_0 : i32, i32, i32
  }
}

</mosaic_0001>

<bundles_post_ra>
// kernel: net12fcn_forward.1
= control target key start
LH: loop header
LB: loop body
LE: loop exit
PB: predicated region body
PF: predicated region fallthrough
CT: control target
= control target key end

     0   :  { %s3145_s23 = smov 0   ;;  %s4172_s0 = inlined_call_operand.vmem [shape: f32[2,288,64], index: 0, kind: input, shape index: {}]   ;;  %s4173_s1 = inlined_call_operand.vmem [shape: f32[16,32], index: 1, kind: input, shape index: {}]   ;;  %s4174_s2 = inlined_call_operand.vmem [shape: f32[16,64,144], index: 2, kind: input, shape index: {}]   ;;  %s4175_s3 = inlined_call_operand.vmem [shape: f32[1,144], index: 3, kind: input, shape index: {}]   ;;  %s4176_s4 = inlined_call_operand.vmem [shape: f32[144,9], index: 4, kind: input, shape index: {}]   ;;  %s4177_s5 = inlined_call_operand.<no memory space> [shape: f32[1,1], index: 5, kind: input, shape index: {}]   ;;  %s4178_s6 = inlined_call_operand.vmem [shape: f32[2,1,9], index: 6, kind: output, shape index: {}]  }
   0x1   :  { %v11_v0 = vstv %s4177_s5 }
   0x2   :  { %12 = vst [vmem:[#allocation2] sm:$0x1] %v11_v0 }
   0x3 LB: > { %s2645_s24 = sadd.s32 4294967295, %s3103_s23   ;;  %p2649_p0 = scmp.ge.s32.totalorder %s3103_s23, 1  ;;  %s3103_s23 = sphi %s3145_s23, %s18_s23  }
   0x4   : > { %p214_p1 = scmp.lt.s32.totalorder %s3103_s23, 3 }
   0x6   : > { %p215_p2 = pnand %p2649_p0, %p214_p1 }
   0x7   : > { %p242_p3 = scmp.lt.s32.totalorder (!%p215_p2), %s2645_s24, 1 }
   0x8   : > { %218 = sbr.rel (%p215_p2) target bundleno = 836 (0x344), region = 44 }
   0xd   : > { %v3156_v1 = vld [vmem:[%s4173_s1] sm:$0xff]  ;;  %vm256_vm0 = vcmask 261120   ;;  %s4180_s24 = smov (!%p242_p3, %s2645_s24), 1  ;;  %v3181_v10 = vld [vmem:[%s4173_s1 + $0x8] sm:$0xff]  ;;  %v2684_v39 = vld [vmem:[%s4174_s2 + $0xf8] sm:$0xff]  ;;  %vm1023_vm1 = vcmask 523264  }
   0xe   : > { %2990 = vmatprep.mubr.msk.f32.mxu0 %vm256_vm0, %v3156_v1  ;;  %3001 = vmatprep.mubr.msk.f32.mxu1 %vm256_vm0, %v3156_v1  ;;  %s3081_s5 = smul.u32 288, %s4180_s24  ;;  %v2702_v40 = vld [vmem:[%s4174_s2 + $0x178] sm:$0xff]  ;;  %v2683_v41 = vld [vmem:[%s4174_s2 + $0xf0] sm:$0xff]  ;;  %v2682_v43 = vld [vmem:[%s4174_s2 + $0xe8] sm:$0xff]  ;;  %vm2516_vm2 = vcmask 130048   ;;  %s249_s8 = scalar_lea.vmem %s4178_s6, %s4180_s24  ;;  %vm2596_vm3 = vcmask 65536  }
   0xf   : > { %v2701_v42 = vld [vmem:[%s4174_s2 + $0x170] sm:$0xff]  ;;  %v2700_v44 = vld [vmem:[%s4174_s2 + $0x168] sm:$0xff]  ;;  %v2681_v45 = vld [vmem:[%s4174_s2 + $0xe0] sm:$0xff] }
  0x10   : > { %s3168_s29 = scalar_lea.vmem %s4172_s0, %s3081_s5  ;;  %v2699_v46 = vld [vmem:[%s4174_s2 + $0x160] sm:$0xff]  ;;  %v2680_v47 = vld [vmem:[%s4174_s2 + $0xd8] sm:$0xff]  ;;  %v2679_v49 = vld [vmem:[%s4174_s2 + $0xd0] sm:$0xff] }
  0x11   : > { %v255_v2 = vld [vmem:[%s3168_s29 + $0x18] sm:$0xff]  ;;  %v254_v4 = vld [vmem:[%s3168_s29 + $0x10] sm:$0xff]  ;;  %v253_v6 = vld [vmem:[%s3168_s29 + $0x8] sm:$0xff] }
  0x12   : > { %v341_v3 = vld [vmem:[%s3168_s29 + $0x38] sm:$0xff]  ;;  %2982 = vmatprep.subr.mxu0 %v255_v2  ;;  %v340_v5 = vld [vmem:[%s3168_s29 + $0x30] sm:$0xff]  ;;  %v339_v7 = vld [vmem:[%s3168_s29 + $0x28] sm:$0xff] }
  0x13   : > { %2993 = vmatprep.subr.mxu1 %v341_v3  ;;  %2983 = vmatpush3.msra.mxu0 %v255_v2  ;;  %v252_v8 = vld [vmem:[%s3168_s29] sm:$0xff]  ;;  %v422_v11 = vld [vmem:[%s3168_s29 + $0x58] sm:$0xff]  ;;  %v421_v13 = vld [vmem:[%s3168_s29 + $0x50] sm:$0xff] }
  0x14   : > { %2994 = vmatpush3.msra.mxu1 %v341_v3  ;;  %2984 = vmatprep.subr.mxu0 %v254_v4  ;;  %v338_v9 = vld [vmem:[%s3168_s29 + $0x20] sm:$0xff]  ;;  %v503_v12 = vld [vmem:[%s3168_s29 + $0x78] sm:$0xff]  ;;  %v502_v14 = vld [vmem:[%s3168_s29 + $0x70] sm:$0xff] }
  0x15   : > { %2995 = vmatprep.subr.mxu1 %v340_v5  ;;  %2985 = vmatpush3.msra.mxu0 %v254_v4  ;;  %v420_v15 = vld [vmem:[%s3168_s29 + $0x48] sm:$0xff]  ;;  %v419_v17 = vld [vmem:[%s3168_s29 + $0x40] sm:$0xff]  ;;  %v584_v19 = vld [vmem:[%s3168_s29 + $0x98] sm:$0xff] }
  0x16   : > { %2996 = vmatpush3.msra.mxu1 %v340_v5  ;;  %2986 = vmatprep.subr.mxu0 %v253_v6  ;;  %v501_v16 = vld [vmem:[%s3168_s29 + $0x68] sm:$0xff]  ;;  %v500_v18 = vld [vmem:[%s3168_s29 + $0x60] sm:$0xff]  ;;  %v583_v20 = vld [vmem:[%s3168_s29 + $0x90] sm:$0xff] }
  0x17   : > { %2997 = vmatprep.subr.mxu1 %v339_v7  ;;  %2987 = vmatpush3.msra.mxu0 %v253_v6  ;;  %v665_v21 = vld [vmem:[%s3168_s29 + $0xb8] sm:$0xff]  ;;  %v582_v22 = vld [vmem:[%s3168_s29 + $0x88] sm:$0xff]  ;;  %v664_v23 = vld [vmem:[%s3168_s29 + $0xb0] sm:$0xff] }
  0x18   : > { %2998 = vmatpush3.msra.mxu1 %v339_v7  ;;  %2988 = vmatprep.subr.mxu0 %v252_v8  ;;  %v581_v24 = vld [vmem:[%s3168_s29 + $0x80] sm:$0xff]  ;;  %v663_v25 = vld [vmem:[%s3168_s29 + $0xa8] sm:$0xff]  ;;  %v746_v27 = vld [vmem:[%s3168_s29 + $0xd8] sm:$0xff] }
  0x19   : > { %2999 = vmatprep.subr.mxu1 %v338_v9  ;;  %2989 = vmatpush3.msra.mxu0 %v252_v8  ;;  %v662_v26 = vld [vmem:[%s3168_s29 + $0xa0] sm:$0xff]  ;;  %v745_v28 = vld [vmem:[%s3168_s29 + $0xd0] sm:$0xff]  ;;  %v827_v29 = vld [vmem:[%s3168_s29 + $0xf8] sm:$0xff] }
  0x1a   : > { %3000 = vmatpush3.msra.mxu1 %v338_v9  ;;  %2991 = vmatmul.mubr.msk.f32.vlgmr.msra.gmra.mxu0 %vm256_vm0, %v3181_v10  ;;  %v744_v30 = vld [vmem:[%s3168_s29 + $0xc8] sm:$0xff]  ;;  %v826_v31 = vld [vmem:[%s3168_s29 + $0xf0] sm:$0xff]  ;;  %v743_v32 = vld [vmem:[%s3168_s29 + $0xc0] sm:$0xff]  ;;  %v3105_v9 = vmov 0.0  }
  0x1b   : > { %3002 = vmatmul.mubr.msk.f32.vlgmr.msra.gmra.mxu1 %vm256_vm0, %v3181_v10  ;;  %3004 = vmatprep.subr.mxu0 %v422_v11  ;;  %v825_v33 = vld [vmem:[%s3168_s29 + $0xe8] sm:$0xff]  ;;  %v824_v34 = vld [vmem:[%s3168_s29 + $0xe0] sm:$0xff]  ;;  %v908_v35 = vld [vmem:[%s3168_s29 + $0x118] sm:$0xff] }
  0x1c   : > { %3015 = vmatprep.subr.mxu1 %v503_v12  ;;  %3005 = vmatpush3.msra.mxu0 %v422_v11  ;;  %v907_v36 = vld [vmem:[%s3168_s29 + $0x110] sm:$0xff]  ;;  %v906_v37 = vld [vmem:[%s3168_s29 + $0x108] sm:$0xff]  ;;  %v905_v38 = vld [vmem:[%s3168_s29 + $0x100] sm:$0xff] }
  0x1d   : > { %3016 = vmatpush3.msra.mxu1 %v503_v12  ;;  %3006 = vmatprep.subr.mxu0 %v421_v13  ;;  %v2698_v48 = vld [vmem:[%s4174_s2 + $0x158] sm:$0xff]  ;;  %v2697_v50 = vld [vmem:[%s4174_s2 + $0x150] sm:$0xff]  ;;  %v2678_v51 = vld [vmem:[%s4174_s2 + $0xc8] sm:$0xff] }
  0x1e   : > { %3017 = vmatprep.subr.mxu1 %v502_v14  ;;  %3007 = vmatpush3.msra.mxu0 %v421_v13  ;;  %v2696_v52 = vld [vmem:[%s4174_s2 + $0x148] sm:$0xff]  ;;  %v2677_v53 = vld [vmem:[%s4174_s2 + $0xc0] sm:$0xff]  ;;  %v2676_v55 = vld [vmem:[%s4174_s2 + $0xb8] sm:$0xff] }
  0x1f   : > { %3018 = vmatpush3.msra.mxu1 %v502_v14  ;;  %3008 = vmatprep.subr.mxu0 %v420_v15  ;;  %v2695_v54 = vld [vmem:[%s4174_s2 + $0x140] sm:$0xff]  ;;  %v2694_v56 = vld [vmem:[%s4174_s2 + $0x138] sm:$0xff]  ;;  %v2675_v57 = vld [vmem:[%s4174_s2 + $0xb0] sm:$0xff] }
  0x20   : > { %3019 = vmatprep.subr.mxu1 %v501_v16  ;;  %3009 = vmatpush3.msra.mxu0 %v420_v15  ;;  %v2693_v58 = vld [vmem:[%s4174_s2 + $0x130] sm:$0xff]  ;;  %v2674_v59 = vld [vmem:[%s4174_s2 + $0xa8] sm:$0xff]  ;;  %v2673_v61 = vld [vmem:[%s4174_s2 + $0xa0] sm:$0xff] }
  0x21   : > { %3012 = vmatprep.mubr.msk.f32.mxu0 %vm256_vm0, %v3156_v1  ;;  %3010 = vmatprep.subr.mxu0 %v419_v17  ;;  %v2692_v60 = vld [vmem:[%s4174_s2 + $0x128] sm:$0xff]  ;;  %v2691_v62 = vld [vmem:[%s4174_s2 + $0x120] sm:$0xff]  ;;  %v2672_v63 = vld [vmem:[%s4174_s2 + $0x98] sm:$0xff] }
  0x22   : > { %3020 = vmatpush3.msra.mxu1 %v501_v16  ;;  %3011 = vmatpush3.msra.mxu0 %v419_v17  ;;  %v2690_v0 = vld [vmem:[%s4174_s2 + $0x118] sm:$0xff]  ;;  %v2689_v2 = vld [vmem:[%s4174_s2 + $0x110] sm:$0xff]  ;;  %v2670_v3 = vld [vmem:[%s4174_s2 + $0x88] sm:$0xff] }
  0x23   : > { %3021 = vmatprep.subr.mxu1 %v500_v18  ;;  %3013 = vmatmul.mubr.msk.f32.vlgmr.msra.gmra.mxu0 %vm256_vm0, %v3181_v10  ;;  %v2688_v4 = vld [vmem:[%s4174_s2 + $0x108] sm:$0xff]  ;;  %v2669_v5 = vld [vmem:[%s4174_s2 + $0x80] sm:$0xff]  ;;  %v1003_v7 = vld [vmem:[%s4174_s2 + $0x78] sm:$0xff] }
  0x24   : > { %3026 = vmatprep.subr.mxu0 %v584_v19  ;;  %3022 = vmatpush3.msra.mxu1 %v500_v18  ;;  %v2687_v6 = vld [vmem:[%s4174_s2 + $0x100] sm:$0xff]  ;;  %v2736_v8 = vld [vmem:[%s4174_s2 + $0x278] sm:$0xff] }
  0x25   : > { %3023 = vmatprep.mubr.msk.f32.mxu1 %vm256_vm0, %v3156_v1  ;;  %3027 = vmatpush3.msra.mxu0 %v584_v19 }
  0x26   : > { %3024 = vmatmul.mubr.msk.f32.vlgmr.msra.gmra.mxu1 %vm256_vm0, %v3181_v10  ;;  %3028 = vmatprep.subr.mxu0 %v583_v20 }
  0x27   : > { %3037 = vmatprep.subr.mxu1 %v665_v21  ;;  %3029 = vmatpush3.msra.mxu0 %v583_v20 }
  0x28   : > { %3038 = vmatpush3.msra.mxu1 %v665_v21  ;;  %3030 = vmatprep.subr.mxu0 %v582_v22 }
  0x29   : > { %3039 = vmatprep.subr.mxu1 %v664_v23  ;;  %3031 = vmatpush3.msra.mxu0 %v582_v22 }
  0x2a   : > { %3040 = vmatpush3.msra.mxu1 %v664_v23  ;;  %3032 = vmatprep.subr.mxu0 %v581_v24 }
  0x2b   : > { %3041 = vmatprep.subr.mxu1 %v663_v25  ;;  %3033 = vmatpush3.msra.mxu0 %v581_v24 }
  0x2c   : > { %3034 = vmatprep.mubr.msk.f32.mxu0 %vm256_vm0, %v3156_v1  ;;  %3042 = vmatpush3.msra.mxu1 %v663_v25 }
  0x2d   : > { %3035 = vmatmul.mubr.msk.f32.vlgmr.msra.gmra.mxu0 %vm256_vm0, %v3181_v10  ;;  %3043 = vmatprep.subr.mxu1 %v662_v26 }
  0x2e   : > { %3048 = vmatprep.subr.mxu0 %v746_v27  ;;  %3044 = vmatpush3.msra.mxu1 %v662_v26 }
  0x2f   : > { %3045 = vmatprep.mubr.msk.f32.mxu1 %vm256_vm0, %v3156_v1  ;;  %3049 = vmatpush3.msra.mxu0 %v746_v27 }
  0x30   : > { %3046 = vmatmul.mubr.msk.f32.vlgmr.msra.gmra.mxu1 %vm256_vm0, %v3181_v10  ;;  %3050 = vmatprep.subr.mxu0 %v745_v28 }
  0x31   : > { %3059 = vmatprep.subr.mxu1 %v827_v29  ;;  %3051 = vmatpush3.msra.mxu0 %v745_v28 }
  0x32   : > { %3060 = vmatpush3.msra.mxu1 %v827_v29  ;;  %3052 = vmatprep.subr.mxu0 %v744_v30 }
  0x33   : > { %3061 = vmatprep.subr.mxu1 %v826_v31  ;;  %3053 = vmatpush3.msra.mxu0 %v744_v30 }
  0x34   : > { %3062 = vmatpush3.msra.mxu1 %v826_v31  ;;  %3054 = vmatprep.subr.mxu0 %v743_v32 }
  0x35   : > { %3063 = vmatprep.subr.mxu1 %v825_v33  ;;  %3055 = vmatpush3.msra.mxu0 %v743_v32 }
  0x36   : > { %3056 = vmatprep.mubr.msk.f32.mxu0 %vm256_vm0, %v3156_v1  ;;  %3064 = vmatpush3.msra.mxu1 %v825_v33 }
  0x37   : > { %3057 = vmatmul.mubr.msk.f32.vlgmr.msra.gmra.mxu0 %vm256_vm0, %v3181_v10  ;;  %3065 = vmatprep.subr.mxu1 %v824_v34 }
  0x38   : > { %3070 = vmatprep.subr.mxu0 %v908_v35  ;;  %3066 = vmatpush3.msra.mxu1 %v824_v34 }
  0x39   : > { %3067 = vmatprep.mubr.msk.f32.mxu1 %vm256_vm0, %v3156_v1  ;;  %3071 = vmatpush3.msra.mxu0 %v908_v35 }
  0x3a   : > { %3068 = vmatmul.mubr.msk.f32.vlgmr.msra.gmra.mxu1 %vm256_vm0, %v3181_v10  ;;  %3072 = vmatprep.subr.mxu0 %v907_v36 }
  0x3b   : > { %3078 = vmatprep.mubr.msk.f32.mxu0 %vm256_vm0, %v3156_v1  ;;  %3073 = vmatpush3.msra.mxu0 %v907_v36  ;;  %v2671_v1 = vld [vmem:[%s4174_s2 + $0x90] sm:$0xff] }
  0x3c   : > { %3074 = vmatprep.subr.mxu0 %v906_v37  ;;  %1206 = vmatprep.subr.mxu1 %v2702_v40  ;;  %v2735_v40 = vld [vmem:[%s4174_s2 + $0x270] sm:$0xff] }
  0x3d   : > { %3075 = vmatpush3.msra.mxu0 %v906_v37  ;;  %1207 = vmatpush1.msra.mxu1 %v2701_v42  ;;  %v2734_v42 = vld [vmem:[%s4174_s2 + $0x268] sm:$0xff] }
  0x3e   : > { %3076 = vmatprep.subr.mxu0 %v905_v38  ;;  %1208 = vmatprep.subr.mxu1 %v2700_v44  ;;  %v2733_v44 = vld [vmem:[%s4174_s2 + $0x260] sm:$0xff] }
  0x3f   : > { %3077 = vmatpush3.msra.mxu0 %v905_v38  ;;  %1209 = vmatpush1.msra.mxu1 %v2699_v46  ;;  %v1002_v38 = vld [vmem:[%s4174_s2 + $0x70] sm:$0xff]  ;;  %v2732_v46 = vld [vmem:[%s4174_s2 + $0x258] sm:$0xff] }
  0x40   : > { %3079 = vmatmul.mubr.msk.f32.vlgmr.msra.gmra.mxu0 %vm256_vm0, %v3181_v10  ;;  %1042 = vmatprep.subr.mxu0 %v2684_v39 }
  0x41   : > { %1043 = vmatpush1.msra.mxu0 %v2683_v41  ;;  %1210 = vmatprep.subr.mxu1 %v2698_v48  ;;  %v1001_v41 = vld [vmem:[%s4174_s2 + $0x68] sm:$0xff]  ;;  %v2731_v48 = vld [vmem:[%s4174_s2 + $0x250] sm:$0xff] }
  0x42   : > { %1044 = vmatprep.subr.mxu0 %v2682_v43  ;;  %1211 = vmatpush1.msra.mxu1 %v2697_v50  ;;  %v1000_v43 = vld [vmem:[%s4174_s2 + $0x60] sm:$0xff]  ;;  %v2730_v50 = vld [vmem:[%s4174_s2 + $0x248] sm:$0xff] }
  0x43   : > { %1045 = vmatpush1.msra.mxu0 %v2681_v45  ;;  %1212 = vmatprep.subr.mxu1 %v2696_v52  ;;  %v999_v45 = vld [vmem:[%s4174_s2 + $0x58] sm:$0xff]  ;;  %v2729_v52 = vld [vmem:[%s4174_s2 + $0x240] sm:$0xff] }
  0x44   : > { %1046 = vmatprep.subr.mxu0 %v2680_v47  ;;  %1213 = vmatpush1.msra.mxu1 %v2695_v54  ;;  %v998_v47 = vld [vmem:[%s4174_s2 + $0x50] sm:$0xff]  ;;  %v2728_v54 = vld [vmem:[%s4174_s2 + $0x238] sm:$0xff] }
  0x45   : > { %1047 = vmatpush1.msra.mxu0 %v2679_v49  ;;  %1214 = vmatprep.subr.mxu1 %v2694_v56  ;;  %v997_v49 = vld [vmem:[%s4174_s2 + $0x48] sm:$0xff]  ;;  %v2727_v56 = vld [vmem:[%s4174_s2 + $0x230] sm:$0xff] }
  0x46   : > { %1048 = vmatprep.subr.mxu0 %v2678_v51  ;;  %1215 = vmatpush1.msra.mxu1 %v2693_v58  ;;  %v996_v51 = vld [vmem:[%s4174_s2 + $0x40] sm:$0xff]  ;;  %v2726_v58 = vld [vmem:[%s4174_s2 + $0x228] sm:$0xff] }
  0x47   : > { %1049 = vmatpush1.msra.mxu0 %v2677_v53  ;;  %1216 = vmatprep.subr.mxu1 %v2692_v60  ;;  %v995_v53 = vld [vmem:[%s4174_s2 + $0x38] sm:$0xff]  ;;  %v2725_v60 = vld [vmem:[%s4174_s2 + $0x220] sm:$0xff] }
  0x48   : > { %1050 = vmatprep.subr.mxu0 %v2676_v55  ;;  %1217 = vmatpush1.msra.mxu1 %v2691_v62  ;;  %v994_v55 = vld [vmem:[%s4174_s2 + $0x30] sm:$0xff]  ;;  %v2724_v62 = vld [vmem:[%s4174_s2 + $0x218] sm:$0xff] }
  0x49   : > { %1051 = vmatpush1.msra.mxu0 %v2675_v57  ;;  %1218 = vmatprep.subr.mxu1 %v2690_v0  ;;  %v993_v57 = vld [vmem:[%s4174_s2 + $0x28] sm:$0xff]  ;;  %v2723_v0 = vld [vmem:[%s4174_s2 + $0x210] sm:$0xff] }
  0x4a   : > { %1052 = vmatprep.subr.mxu0 %v2674_v59  ;;  %1219 = vmatpush1.msra.mxu1 %v2689_v2  ;;  %v992_v59 = vld [vmem:[%s4174_s2 + $0x20] sm:$0xff]  ;;  %v2722_v2 = vld [vmem:[%s4174_s2 + $0x208] sm:$0xff] }
  0x4b   : > { %1053 = vmatpush1.msra.mxu0 %v2673_v61  ;;  %1220 = vmatprep.subr.mxu1 %v2688_v4  ;;  %v991_v61 = vld [vmem:[%s4174_s2 + $0x18] sm:$0xff]  ;;  %v2721_v4 = vld [vmem:[%s4174_s2 + $0x200] sm:$0xff] }
  0x4c   : > { %1054 = vmatprep.subr.mxu0 %v2672_v63  ;;  %1221 = vmatpush1.msra.mxu1 %v2687_v6  ;;  %v990_v63 = vld [vmem:[%s4174_s2 + $0x10] sm:$0xff]  ;;  %v2770_v6 = vld [vmem:[%s4174_s2 + $0x378] sm:$0xff] }
  0x4d   : > { %1055 = vmatpush1.msra.mxu0 %v2671_v1  ;;  %1090 = vmatprep.mubr.f32.mxu0 %v3105_v9  ;;  %v989_v1 = vld [vmem:[%s4174_s2 + $0x8] sm:$0xff] }
  0x4e   : > { %1056 = vmatprep.subr.mxu0 %v2670_v3  ;;  %1254 = vmatprep.mubr.f32.mxu1 %v3105_v9  ;;  %v988_v3 = vld [vmem:[%s4174_s2] sm:$0xff] }
  0x4f   : > { %1057 = vmatpush1.msra.mxu0 %v2669_v5  ;;  %1392 = vmatprep.subr.mxu1 %v2736_v8  ;;  %v2719_v5 = vld [vmem:[%s4174_s2 + $0x1f8] sm:$0xff]  ;;  %v2718_v8 = vld [vmem:[%s4174_s2 + $0x1f0] sm:$0xff] }
  0x50   : > { %1115 = vmatprep.subr.mxu0 %v1003_v7 }
  0xda   : > { %v3347_v10 = vpop.f32.mrf.mxu0 }
  0xdb   : > { %v3349_v11 = vpop.f32.mrf.mxu1 }
  0xdc   : > { %v329_v12 = vpop.f32.mrf.mxu0 }
  0xdd   : > { %v408_v14 = vpop.f32.mrf.mxu1 }
  0xde   : > { %v417_v17 = vmax.f32 %v329_v12, %v408_v14  ;;  %v2769_v12 = vld [vmem:[%s4174_s2 + $0x370] sm:$0xff]  ;;  %v2717_v14 = vld [vmem:[%s4174_s2 + $0x1e8] sm:$0xff] }
  0xe3   : > { %v3351_v13 = vpop.f32.mrf.mxu0 }
  0xe5   : > { %v489_v15 = vpop.f32.mrf.mxu0 }
  0xe6   : > { %v3353_v16 = vpop.f32.mrf.mxu1  ;;  %v498_v19 = vmax.f32 %v417_v17, %v489_v15  ;;  %v2768_v15 = vld [vmem:[%s4174_s2 + $0x368] sm:$0xff]  ;;  %v2716_v17 = vld [vmem:[%s4174_s2 + $0x1e0] sm:$0xff] }
  0xe8   : > { %v570_v20 = vpop.f32.mrf.mxu1 }
  0xe9   : > { %v579_v23 = vmax.f32 %v498_v19, %v570_v20  ;;  %v2767_v19 = vld [vmem:[%s4174_s2 + $0x360] sm:$0xff]  ;;  %v2715_v20 = vld [vmem:[%s4174_s2 + $0x1d8] sm:$0xff] }
  0xed   : > { %v3355_v18 = vpop.f32.mrf.mxu0 }
  0xef   : > { %v651_v21 = vpop.f32.mrf.mxu0 }
  0xf0   : > { %v3357_v22 = vpop.f32.mrf.mxu1  ;;  %v660_v25 = vmax.f32 %v579_v23, %v651_v21  ;;  %v2766_v21 = vld [vmem:[%s4174_s2 + $0x358] sm:$0xff]  ;;  %v2714_v23 = vld [vmem:[%s4174_s2 + $0x1d0] sm:$0xff] }
  0xf2   : > { %v732_v26 = vpop.f32.mrf.mxu1 }
  0xf3   : > { %v741_v29 = vmax.f32 %v660_v25, %v732_v26  ;;  %v2765_v25 = vld [vmem:[%s4174_s2 + $0x350] sm:$0xff]  ;;  %v2713_v26 = vld [vmem:[%s4174_s2 + $0x1c8] sm:$0xff] }
  0xf7   : > { %v3359_v24 = vpop.f32.mrf.mxu0 }
  0xf9   : > { %v813_v27 = vpop.f32.mrf.mxu0 }
  0xfa   : > { %v3361_v28 = vpop.f32.mrf.mxu1  ;;  %v822_v30 = vmax.f32 %v741_v29, %v813_v27  ;;  %v2764_v27 = vld [vmem:[%s4174_s2 + $0x348] sm:$0xff]  ;;  %v2712_v29 = vld [vmem:[%s4174_s2 + $0x1c0] sm:$0xff] }
  0xfc   : > { %v894_v31 = vpop.f32.mrf.mxu1 }
  0xfd   : > { %v903_v33 = vmax.f32 %v822_v30, %v894_v31  ;;  %v2763_v30 = vld [vmem:[%s4174_s2 + $0x340] sm:$0xff]  ;;  %v2711_v31 = vld [vmem:[%s4174_s2 + $0x1b8] sm:$0xff] }
 0x100   : > { %v3363_v32 = vpop.f32.mrf.mxu0 }
 0x102   : > { %v975_v34 = vpop.f32.mrf.mxu0 }
 0x103   : > { %v984_v35 = vmax.f32 %v903_v33, %v975_v34  ;;  %v2762_v33 = vld [vmem:[%s4174_s2 + $0x338] sm:$0xff]  ;;  %v2710_v34 = vld [vmem:[%s4174_s2 + $0x1b0] sm:$0xff] }
 0x105   : > { %v3365_v36 = vmax.f32 %v984_v35, 0.0  ;;  %v2761_v35 = vld [vmem:[%s4174_s2 + $0x330] sm:$0xff] }
 0x107   : > { %v1022_v37 = vrot.slane %v3365_v36, 1  ;;  %v1187_v39 = vrot.slane %v3365_v36, 2  ;;  %v1373_v7 = vrot.slane %v3365_v36, 4 }
 0x109   : > { %2685 = vmatmul.mubr.msk.f32.vlgmr.msra.gmra.mxu0 %vm1023_vm1, %v1022_v37  ;;  %2703 = vmatmul.mubr.msk.f32.vlgmr.msra.gmra.mxu1 %vm1023_vm1, %v1187_v39  ;;  %v2709_v37 = vld [vmem:[%s4174_s2 + $0x1a8] sm:$0xff]  ;;  %v2708_v39 = vld [vmem:[%s4174_s2 + $0x1a0] sm:$0xff] }
 0x10a   : > { %1116 = vmatpush1.msra.mxu0 %v1002_v38  ;;  %1393 = vmatpush1.msra.mxu1 %v2735_v40  ;;  %v2760_v38 = vld [vmem:[%s4174_s2 + $0x328] sm:$0xff]  ;;  %v2759_v40 = vld [vmem:[%s4174_s2 + $0x320] sm:$0xff] }
 0x10b   : > { %1117 = vmatprep.subr.mxu0 %v1001_v41  ;;  %1394 = vmatprep.subr.mxu1 %v2734_v42  ;;  %v2707_v41 = vld [vmem:[%s4174_s2 + $0x198] sm:$0xff] }
 0x10c   : > { %1118 = vmatpush1.msra.mxu0 %v1000_v43  ;;  %1395 = vmatpush1.msra.mxu1 %v2733_v44  ;;  %v2758_v42 = vld [vmem:[%s4174_s2 + $0x318] sm:$0xff]  ;;  %v418_v43 = vmax.f32 %v3347_v10, %v3349_v11  ;;  %v2706_v44 = vld [vmem:[%s4174_s2 + $0x190] sm:$0xff]  ;;  %v2756_v10 = vld [vmem:[%s4174_s2 + $0x308] sm:$0xff] }
 0x10d   : > { %1119 = vmatprep.subr.mxu0 %v999_v45  ;;  %1396 = vmatprep.subr.mxu1 %v2732_v46  ;;  %v2757_v45 = vld [vmem:[%s4174_s2 + $0x310] sm:$0xff]  ;;  %v2705_v46 = vld [vmem:[%s4174_s2 + $0x188] sm:$0xff] }
 0x10e   : > { %1120 = vmatpush1.msra.mxu0 %v998_v47  ;;  %1397 = vmatpush1.msra.mxu1 %v2731_v48  ;;  %v499_v11 = vmax.f32 %v418_v43, %v3351_v13  ;;  %v2704_v47 = vld [vmem:[%s4174_s2 + $0x180] sm:$0xff]  ;;  %v1280_v13 = vrot.slane %v3365_v36, 3  ;;  %v2781_v43 = vld [vmem:[%s4174_s2 + $0x3c8] sm:$0xff] }
 0x10f   : > { %1121 = vmatprep.subr.mxu0 %v997_v49  ;;  %1398 = vmatprep.subr.mxu1 %v2730_v50  ;;  %v2755_v48 = vld [vmem:[%s4174_s2 + $0x300] sm:$0xff]  ;;  %v2753_v49 = vld [vmem:[%s4174_s2 + $0x2f8] sm:$0xff] }
 0x110   : > { %1122 = vmatpush1.msra.mxu0 %v996_v51  ;;  %1399 = vmatpush1.msra.mxu1 %v2729_v52  ;;  %v2804_v50 = vld [vmem:[%s4174_s2 + $0x478] sm:$0xff]  ;;  %v580_v51 = vmax.f32 %v499_v11, %v3353_v16  ;;  %v1559_v52 = vrot.slane %v3365_v36, 6  ;;  %v2751_v16 = vld [vmem:[%s4174_s2 + $0x2e8] sm:$0xff] }
 0x111   : > { %1123 = vmatprep.subr.mxu0 %v995_v53  ;;  %1400 = vmatprep.subr.mxu1 %v2728_v54  ;;  %v2752_v53 = vld [vmem:[%s4174_s2 + $0x2f0] sm:$0xff]  ;;  %v2830_v11 = vld [vmem:[%s4174_s2 + $0x538] sm:$0xff] }
 0x112   : > { %1124 = vmatpush1.msra.mxu0 %v994_v55  ;;  %1401 = vmatpush1.msra.mxu1 %v2727_v56  ;;  %v2803_v54 = vld [vmem:[%s4174_s2 + $0x470] sm:$0xff]  ;;  %v2802_v55 = vld [vmem:[%s4174_s2 + $0x468] sm:$0xff]  ;;  %v661_v56 = vmax.f32 %v580_v51, %v3355_v18  ;;  %v2800_v18 = vld [vmem:[%s4174_s2 + $0x458] sm:$0xff] }
 0x113   : > { %1125 = vmatprep.subr.mxu0 %v993_v57  ;;  %1402 = vmatprep.subr.mxu1 %v2726_v58  ;;  %v2750_v57 = vld [vmem:[%s4174_s2 + $0x2e0] sm:$0xff] }
 0x114   : > { %1126 = vmatpush1.msra.mxu0 %v992_v59  ;;  %1403 = vmatpush1.msra.mxu1 %v2725_v60  ;;  %v2801_v58 = vld [vmem:[%s4174_s2 + $0x460] sm:$0xff]  ;;  %v2749_v59 = vld [vmem:[%s4174_s2 + $0x2d8] sm:$0xff]  ;;  %v2748_v60 = vld [vmem:[%s4174_s2 + $0x2d0] sm:$0xff] }
 0x115   : > { %1127 = vmatprep.subr.mxu0 %v991_v61  ;;  %1404 = vmatprep.subr.mxu1 %v2724_v62  ;;  %v2799_v61 = vld [vmem:[%s4174_s2 + $0x450] sm:$0xff]  ;;  %v2747_v62 = vld [vmem:[%s4174_s2 + $0x2c8] sm:$0xff]  ;;  %v2827_v51 = vld [vmem:[%s4174_s2 + $0x520] sm:$0xff] }
 0x116   : > { %1128 = vmatpush1.msra.mxu0 %v990_v63  ;;  %1405 = vmatpush1.msra.mxu1 %v2723_v0  ;;  %v2798_v63 = vld [vmem:[%s4174_s2 + $0x448] sm:$0xff]  ;;  %v742_v0 = vmax.f32 %v661_v56, %v3357_v22  ;;  %v2796_v22 = vld [vmem:[%s4174_s2 + $0x438] sm:$0xff] }
 0x117   : > { %1129 = vmatprep.subr.mxu0 %v989_v1  ;;  %1406 = vmatprep.subr.mxu1 %v2722_v2  ;;  %v2746_v1 = vld [vmem:[%s4174_s2 + $0x2c0] sm:$0xff]  ;;  %v2824_v56 = vld [vmem:[%s4174_s2 + $0x508] sm:$0xff] }
 0x118   : > { %1130 = vmatpush1.msra.mxu0 %v988_v3  ;;  %1163 = vmatprep.mubr.f32.mxu0 %v3105_v9  ;;  %v2797_v2 = vld [vmem:[%s4174_s2 + $0x440] sm:$0xff]  ;;  %v2745_v3 = vld [vmem:[%s4174_s2 + $0x2b8] sm:$0xff] }
 0x119   : > { %1407 = vmatpush1.msra.mxu1 %v2721_v4  ;;  %1440 = vmatprep.mubr.f32.mxu1 %v3105_v9  ;;  %v823_v4 = vmax.f32 %v742_v0, %v3359_v24  ;;  %v2794_v24 = vld [vmem:[%s4174_s2 + $0x428] sm:$0xff] }
 0x11a   : > { %2686 = vmatmul.mubr.msk.f32.vlgmr.msra.gmra.mxu0 %vm1023_vm1, %v3365_v36  ;;  %1299 = vmatprep.subr.mxu0 %v2719_v5  ;;  %v2744_v5 = vld [vmem:[%s4174_s2 + $0x2b0] sm:$0xff]  ;;  %v2870_v0 = vld [vmem:[%s4174_s2 + $0x668] sm:$0xff] }
 0x11b   : > { %2737 = vmatmul.mubr.msk.f32.vlgmr.msra.gmra.mxu1 %vm1023_vm1, %v1373_v7  ;;  %1578 = vmatprep.subr.mxu1 %v2770_v6  ;;  %v2795_v6 = vld [vmem:[%s4174_s2 + $0x430] sm:$0xff]  ;;  %v2743_v7 = vld [vmem:[%s4174_s2 + $0x2a8] sm:$0xff] }
 0x11c   : > { %1300 = vmatpush1.msra.mxu0 %v2718_v8  ;;  %1579 = vmatpush1.msra.mxu1 %v2769_v12  ;;  %v2742_v8 = vld [vmem:[%s4174_s2 + $0x2a0] sm:$0xff] }
 0x11d   : > { %1301 = vmatprep.subr.mxu0 %v2717_v14  ;;  %1580 = vmatprep.subr.mxu1 %v2768_v15  ;;  %v2793_v12 = vld [vmem:[%s4174_s2 + $0x420] sm:$0xff]  ;;  %v2741_v14 = vld [vmem:[%s4174_s2 + $0x298] sm:$0xff] }
 0x11e   : > { %1302 = vmatpush1.msra.mxu0 %v2716_v17  ;;  %1581 = vmatpush1.msra.mxu1 %v2767_v19  ;;  %v2792_v15 = vld [vmem:[%s4174_s2 + $0x418] sm:$0xff]  ;;  %v904_v17 = vmax.f32 %v823_v4, %v3361_v28  ;;  %v2740_v19 = vld [vmem:[%s4174_s2 + $0x290] sm:$0xff]  ;;  %v2790_v28 = vld [vmem:[%s4174_s2 + $0x408] sm:$0xff] }
 0x11f   : > { %1303 = vmatprep.subr.mxu0 %v2715_v20  ;;  %1582 = vmatprep.subr.mxu1 %v2766_v21  ;;  %v2791_v20 = vld [vmem:[%s4174_s2 + $0x410] sm:$0xff]  ;;  %v2739_v21 = vld [vmem:[%s4174_s2 + $0x288] sm:$0xff] }
 0x120   : > { %1304 = vmatpush1.msra.mxu0 %v2714_v23  ;;  %1583 = vmatpush1.msra.mxu1 %v2765_v25  ;;  %v985_v23 = vmax.f32 %v904_v17, %v3363_v32  ;;  %v2738_v25 = vld [vmem:[%s4174_s2 + $0x280] sm:$0xff]  ;;  %v1466_v32 = vrot.slane %v3365_v36, 5  ;;  %v2816_v4 = vld [vmem:[%s4174_s2 + $0x4d0] sm:$0xff] }
 0x121   : > { %1305 = vmatprep.subr.mxu0 %v2713_v26  ;;  %1584 = vmatprep.subr.mxu1 %v2764_v27  ;;  %v2789_v26 = vld [vmem:[%s4174_s2 + $0x400] sm:$0xff]  ;;  %v2787_v27 = vld [vmem:[%s4174_s2 + $0x3f8] sm:$0xff]  ;;  %v2863_v17 = vld [vmem:[%s4174_s2 + $0x630] sm:$0xff] }
 0x122   : > { %1306 = vmatpush1.msra.mxu0 %v2712_v29  ;;  %1585 = vmatpush1.msra.mxu1 %v2763_v30  ;;  %v2838_v29 = vld [vmem:[%s4174_s2 + $0x578] sm:$0xff]  ;;  %v3682_v30 = vmax.f32 %v985_v23, 0.0 }
 0x123   : > { %1307 = vmatprep.subr.mxu0 %v2711_v31  ;;  %1586 = vmatprep.subr.mxu1 %v2762_v33  ;;  %v2786_v31 = vld [vmem:[%s4174_s2 + $0x3f0] sm:$0xff]  ;;  %v2809_v23 = vld [vmem:[%s4174_s2 + $0x498] sm:$0xff] }
 0x124   : > { %1308 = vmatpush1.msra.mxu0 %v2710_v34  ;;  %1587 = vmatpush1.msra.mxu1 %v2761_v35  ;;  %v2837_v33 = vld [vmem:[%s4174_s2 + $0x570] sm:$0xff]  ;;  %v2785_v34 = vld [vmem:[%s4174_s2 + $0x3e8] sm:$0xff] }
 0x125   : > { %1309 = vmatprep.subr.mxu0 %v2709_v37  ;;  %1588 = vmatprep.subr.mxu1 %v2760_v38  ;;  %v2836_v35 = vld [vmem:[%s4174_s2 + $0x568] sm:$0xff]  ;;  %v2784_v37 = vld [vmem:[%s4174_s2 + $0x3e0] sm:$0xff] }
 0x126   : > { %1310 = vmatpush1.msra.mxu0 %v2708_v39  ;;  %1589 = vmatpush1.msra.mxu1 %v2759_v40  ;;  %v2835_v38 = vld [vmem:[%s4174_s2 + $0x560] sm:$0xff]  ;;  %v2783_v39 = vld [vmem:[%s4174_s2 + $0x3d8] sm:$0xff] }
 0x127   : > { %1311 = vmatprep.subr.mxu0 %v2707_v41  ;;  %1590 = vmatprep.subr.mxu1 %v2758_v42  ;;  %v2834_v40 = vld [vmem:[%s4174_s2 + $0x558] sm:$0xff]  ;;  %v2782_v41 = vld [vmem:[%s4174_s2 + $0x3d0] sm:$0xff] }
 0x128   : > { %1312 = vmatpush1.msra.mxu0 %v2706_v44  ;;  %1591 = vmatpush1.msra.mxu1 %v2757_v45  ;;  %v2833_v42 = vld [vmem:[%s4174_s2 + $0x550] sm:$0xff]  ;;  %v2832_v44 = vld [vmem:[%s4174_s2 + $0x548] sm:$0xff]  ;;  %v2780_v45 = vld [vmem:[%s4174_s2 + $0x3c0] sm:$0xff] }
 0x129   : > { %1313 = vmatprep.subr.mxu0 %v2705_v46  ;;  %1592 = vmatprep.subr.mxu1 %v2756_v10  ;;  %v2831_v46 = vld [vmem:[%s4174_s2 + $0x540] sm:$0xff]  ;;  %v2779_v10 = vld [vmem:[%s4174_s2 + $0x3b8] sm:$0xff] }
 0x12a   : > { %1314 = vmatpush1.msra.mxu0 %v2704_v47  ;;  %1347 = vmatprep.mubr.f32.mxu0 %v3105_v9  ;;  %v2778_v47 = vld [vmem:[%s4174_s2 + $0x3b0] sm:$0xff] }
 0x12b   : > { %1593 = vmatpush1.msra.mxu1 %v2755_v48  ;;  %1626 = vmatprep.mubr.f32.mxu1 %v3105_v9  ;;  %v2829_v48 = vld [vmem:[%s4174_s2 + $0x530] sm:$0xff] }
 0x12c   : > { %2720 = vmatmul.mubr.msk.f32.vlgmr.msra.gmra.mxu0 %vm1023_vm1, %v1280_v13  ;;  %1485 = vmatprep.subr.mxu0 %v2753_v49  ;;  %v2777_v49 = vld [vmem:[%s4174_s2 + $0x3a8] sm:$0xff] }
 0x12d   : > { %2771 = vmatmul.mubr.msk.f32.vlgmr.msra.gmra.mxu1 %vm1023_vm1, %v1559_v52  ;;  %1764 = vmatprep.subr.mxu1 %v2804_v50  ;;  %v2828_v13 = vld [vmem:[%s4174_s2 + $0x528] sm:$0xff]  ;;  %v2776_v50 = vld [vmem:[%s4174_s2 + $0x3a0] sm:$0xff]  ;;  %v2775_v52 = vld [vmem:[%s4174_s2 + $0x398] sm:$0xff] }
 0x12e   : > { %1486 = vmatpush1.msra.mxu0 %v2752_v53  ;;  %1765 = vmatpush1.msra.mxu1 %v2803_v54  ;;  %v2826_v53 = vld [vmem:[%s4174_s2 + $0x518] sm:$0xff]  ;;  %v2774_v54 = vld [vmem:[%s4174_s2 + $0x390] sm:$0xff] }
 0x12f   : > { %1487 = vmatprep.subr.mxu0 %v2751_v16  ;;  %1766 = vmatprep.subr.mxu1 %v2802_v55  ;;  %v2825_v16 = vld [vmem:[%s4174_s2 + $0x510] sm:$0xff]  ;;  %v2773_v55 = vld [vmem:[%s4174_s2 + $0x388] sm:$0xff] }
 0x130   : > { %1488 = vmatpush1.msra.mxu0 %v2750_v57  ;;  %1767 = vmatpush1.msra.mxu1 %v2801_v58  ;;  %v2772_v57 = vld [vmem:[%s4174_s2 + $0x380] sm:$0xff] }
 0x131   : > { %1489 = vmatprep.subr.mxu0 %v2749_v59  ;;  %1768 = vmatprep.subr.mxu1 %v2800_v18  ;;  %v2823_v58 = vld [vmem:[%s4174_s2 + $0x500] sm:$0xff]  ;;  %v2821_v59 = vld [vmem:[%s4174_s2 + $0x4f8] sm:$0xff]  ;;  %v1652_v18 = vrot.slane %v3365_v36, 7  ;;  %v2819_v36 = vld [vmem:[%s4174_s2 + $0x4e8] sm:$0xff] }
 0x132   : > { %1490 = vmatpush1.msra.mxu0 %v2748_v60  ;;  %1769 = vmatpush1.msra.mxu1 %v2799_v61  ;;  %v2872_v60 = vld [vmem:[%s4174_s2 + $0x678] sm:$0xff]  ;;  %v1931_v61 = vrot.slane %v3682_v30, 2 }
 0x133   : > { %1491 = vmatprep.subr.mxu0 %v2747_v62  ;;  %1770 = vmatprep.subr.mxu1 %v2798_v63  ;;  %v2820_v62 = vld [vmem:[%s4174_s2 + $0x4f0] sm:$0xff] }
 0x134   : > { %1492 = vmatpush1.msra.mxu0 %v2746_v1  ;;  %1771 = vmatpush1.msra.mxu1 %v2797_v2  ;;  %v2871_v63 = vld [vmem:[%s4174_s2 + $0x670] sm:$0xff]  ;;  %v2818_v1 = vld [vmem:[%s4174_s2 + $0x4e0] sm:$0xff] }
 0x135   : > { %1493 = vmatprep.subr.mxu0 %v2745_v3  ;;  %1772 = vmatprep.subr.mxu1 %v2796_v22  ;;  %v2869_v2 = vld [vmem:[%s4174_s2 + $0x660] sm:$0xff]  ;;  %v2817_v3 = vld [vmem:[%s4174_s2 + $0x4d8] sm:$0xff] }
 0x136   : > { %1494 = vmatpush1.msra.mxu0 %v2744_v5  ;;  %1773 = vmatpush1.msra.mxu1 %v2795_v6  ;;  %v2868_v22 = vld [vmem:[%s4174_s2 + $0x658] sm:$0xff]  ;;  %v2867_v5 = vld [vmem:[%s4174_s2 + $0x650] sm:$0xff]  ;;  %v2815_v6 = vld [vmem:[%s4174_s2 + $0x4c8] sm:$0xff] }
 0x137   : > { %1495 = vmatprep.subr.mxu0 %v2743_v7  ;;  %1774 = vmatprep.subr.mxu1 %v2794_v24  ;;  %v2866_v7 = vld [vmem:[%s4174_s2 + $0x648] sm:$0xff]  ;;  %v2814_v24 = vld [vmem:[%s4174_s2 + $0x4c0] sm:$0xff] }
 0x138   : > { %1496 = vmatpush1.msra.mxu0 %v2742_v8  ;;  %1775 = vmatpush1.msra.mxu1 %v2793_v12  ;;  %v2865_v8 = vld [vmem:[%s4174_s2 + $0x640] sm:$0xff]  ;;  %v2813_v12 = vld [vmem:[%s4174_s2 + $0x4b8] sm:$0xff] }
 0x139   : > { %1497 = vmatprep.subr.mxu0 %v2741_v14  ;;  %1776 = vmatprep.subr.mxu1 %v2792_v15  ;;  %v2864_v14 = vld [vmem:[%s4174_s2 + $0x638] sm:$0xff]  ;;  %v2812_v15 = vld [vmem:[%s4174_s2 + $0x4b0] sm:$0xff] }
 0x13a   : > { %1498 = vmatpush1.msra.mxu0 %v2740_v19  ;;  %1777 = vmatpush1.msra.mxu1 %v2791_v20  ;;  %v2811_v19 = vld [vmem:[%s4174_s2 + $0x4a8] sm:$0xff] }
 0x13b   : > { %1499 = vmatprep.subr.mxu0 %v2739_v21  ;;  %1778 = vmatprep.subr.mxu1 %v2790_v28  ;;  %v2862_v20 = vld [vmem:[%s4174_s2 + $0x628] sm:$0xff]  ;;  %v2810_v21 = vld [vmem:[%s4174_s2 + $0x4a0] sm:$0xff] }
 0x13c   : > { %1500 = vmatpush1.msra.mxu0 %v2738_v25  ;;  %1533 = vmatprep.mubr.f32.mxu0 %v3105_v9  ;;  %v2861_v28 = vld [vmem:[%s4174_s2 + $0x620] sm:$0xff]  ;;  %v2860_v25 = vld [vmem:[%s4174_s2 + $0x618] sm:$0xff] }
 0x13d   : > { %1779 = vmatpush1.msra.mxu1 %v2789_v26  ;;  %1812 = vmatprep.mubr.f32.mxu1 %v3105_v9  ;;  %v2808_v26 = vld [vmem:[%s4174_s2 + $0x490] sm:$0xff] }
 0x13e   : > { %2754 = vmatmul.mubr.msk.f32.vlgmr.msra.gmra.mxu0 %vm1023_vm1, %v1466_v32  ;;  %1671 = vmatprep.subr.mxu0 %v2787_v27  ;;  %v2859_v27 = vld [vmem:[%s4174_s2 + $0x610] sm:$0xff]  ;;  %v2807_v32 = vld [vmem:[%s4174_s2 + $0x488] sm:$0xff] }
 0x13f   : > { %2805 = vmatmul.mubr.msk.f32.vlgmr.msra.gmra.mxu1 %vm1023_vm1, %v3682_v30  ;;  %1950 = vmatprep.subr.mxu1 %v2838_v29  ;;  %v2858_v29 = vld [vmem:[%s4174_s2 + $0x608] sm:$0xff] }
 0x140   : > { %1672 = vmatpush1.msra.mxu0 %v2786_v31  ;;  %1951 = vmatpush1.msra.mxu1 %v2837_v33  ;;  %v2806_v31 = vld [vmem:[%s4174_s2 + $0x480] sm:$0xff] }
 0x141   : > { %1673 = vmatprep.subr.mxu0 %v2785_v34  ;;  %1952 = vmatprep.subr.mxu1 %v2836_v35  ;;  %v2857_v33 = vld [vmem:[%s4174_s2 + $0x600] sm:$0xff]  ;;  %v2855_v34 = vld [vmem:[%s4174_s2 + $0x5f8] sm:$0xff]  ;;  %v1838_v35 = vrot.slane %v3682_v30, 1 }
 0x142   : > { %1674 = vmatpush1.msra.mxu0 %v2784_v37  ;;  %1953 = vmatpush1.msra.mxu1 %v2835_v38  ;;  %v2906_v37 = vld [vmem:[%s4174_s2 + $0x778] sm:$0xff]  ;;  %v2117_v38 = vrot.slane %v3682_v30, 4 }
 0x143   : > { %1675 = vmatprep.subr.mxu0 %v2783_v39  ;;  %1954 = vmatprep.subr.mxu1 %v2834_v40  ;;  %v2854_v39 = vld [vmem:[%s4174_s2 + $0x5f0] sm:$0xff] }
 0x144   : > { %1676 = vmatpush1.msra.mxu0 %v2782_v41  ;;  %1955 = vmatpush1.msra.mxu1 %v2833_v42  ;;  %v2905_v40 = vld [vmem:[%s4174_s2 + $0x770] sm:$0xff]  ;;  %v2853_v41 = vld [vmem:[%s4174_s2 + $0x5e8] sm:$0xff] }
 0x145   : > { %1677 = vmatprep.subr.mxu0 %v2781_v43  ;;  %1956 = vmatprep.subr.mxu1 %v2832_v44  ;;  %v2904_v42 = vld [vmem:[%s4174_s2 + $0x768] sm:$0xff]  ;;  %v2852_v43 = vld [vmem:[%s4174_s2 + $0x5e0] sm:$0xff] }
 0x146   : > { %1678 = vmatpush1.msra.mxu0 %v2780_v45  ;;  %1957 = vmatpush1.msra.mxu1 %v2831_v46  ;;  %v2903_v44 = vld [vmem:[%s4174_s2 + $0x760] sm:$0xff]  ;;  %v2851_v45 = vld [vmem:[%s4174_s2 + $0x5d8] sm:$0xff] }
 0x147   : > { %1679 = vmatprep.subr.mxu0 %v2779_v10  ;;  %1958 = vmatprep.subr.mxu1 %v2830_v11  ;;  %v2902_v46 = vld [vmem:[%s4174_s2 + $0x758] sm:$0xff]  ;;  %v2850_v10 = vld [vmem:[%s4174_s2 + $0x5d0] sm:$0xff] }
 0x148   : > { %1680 = vmatpush1.msra.mxu0 %v2778_v47  ;;  %1959 = vmatpush1.msra.mxu1 %v2829_v48  ;;  %v2901_v11 = vld [vmem:[%s4174_s2 + $0x750] sm:$0xff]  ;;  %v2849_v47 = vld [vmem:[%s4174_s2 + $0x5c8] sm:$0xff] }
 0x149   : > { %1681 = vmatprep.subr.mxu0 %v2777_v49  ;;  %1960 = vmatprep.subr.mxu1 %v2828_v13  ;;  %v2900_v48 = vld [vmem:[%s4174_s2 + $0x748] sm:$0xff]  ;;  %v2848_v49 = vld [vmem:[%s4174_s2 + $0x5c0] sm:$0xff] }
 0x14a   : > { %1682 = vmatpush1.msra.mxu0 %v2776_v50  ;;  %1961 = vmatpush1.msra.mxu1 %v2827_v51  ;;  %v2899_v13 = vld [vmem:[%s4174_s2 + $0x740] sm:$0xff]  ;;  %v2847_v50 = vld [vmem:[%s4174_s2 + $0x5b8] sm:$0xff] }
 0x14b   : > { %1683 = vmatprep.subr.mxu0 %v2775_v52  ;;  %1962 = vmatprep.subr.mxu1 %v2826_v53  ;;  %v2898_v51 = vld [vmem:[%s4174_s2 + $0x738] sm:$0xff]  ;;  %v2846_v52 = vld [vmem:[%s4174_s2 + $0x5b0] sm:$0xff] }
 0x14c   : > { %1684 = vmatpush1.msra.mxu0 %v2774_v54  ;;  %1963 = vmatpush1.msra.mxu1 %v2825_v16  ;;  %v2897_v53 = vld [vmem:[%s4174_s2 + $0x730] sm:$0xff]  ;;  %v2845_v54 = vld [vmem:[%s4174_s2 + $0x5a8] sm:$0xff] }
 0x14d   : > { %1685 = vmatprep.subr.mxu0 %v2773_v55  ;;  %1964 = vmatprep.subr.mxu1 %v2824_v56  ;;  %v2896_v16 = vld [vmem:[%s4174_s2 + $0x728] sm:$0xff]  ;;  %v2844_v55 = vld [vmem:[%s4174_s2 + $0x5a0] sm:$0xff] }
 0x14e   : > { %1686 = vmatpush1.msra.mxu0 %v2772_v57  ;;  %1719 = vmatprep.mubr.f32.mxu0 %v3105_v9  ;;  %v2895_v56 = vld [vmem:[%s4174_s2 + $0x720] sm:$0xff]  ;;  %v2843_v57 = vld [vmem:[%s4174_s2 + $0x598] sm:$0xff] }
 0x14f   : > { %1965 = vmatpush1.msra.mxu1 %v2823_v58  ;;  %1998 = vmatprep.mubr.f32.mxu1 %v3105_v9  ;;  %v2894_v58 = vld [vmem:[%s4174_s2 + $0x718] sm:$0xff] }
 0x150   : > { %2788 = vmatmul.mubr.msk.f32.vlgmr.msra.gmra.mxu0 %vm1023_vm1, %v1652_v18  ;;  %1857 = vmatprep.subr.mxu0 %v2821_v59  ;;  %v2842_v59 = vld [vmem:[%s4174_s2 + $0x590] sm:$0xff] }
 0x151   : > { %2839 = vmatmul.mubr.msk.f32.vlgmr.msra.gmra.mxu1 %vm1023_vm1, %v1931_v61  ;;  %2136 = vmatprep.subr.mxu1 %v2872_v60  ;;  %v2893_v18 = vld [vmem:[%s4174_s2 + $0x710] sm:$0xff]  ;;  %v2841_v60 = vld [vmem:[%s4174_s2 + $0x588] sm:$0xff] }
 0x152   : > { %1858 = vmatpush1.msra.mxu0 %v2820_v62  ;;  %2137 = vmatpush1.msra.mxu1 %v2871_v63  ;;  %v2892_v61 = vld [vmem:[%s4174_s2 + $0x708] sm:$0xff]  ;;  %v2840_v62 = vld [vmem:[%s4174_s2 + $0x580] sm:$0xff] }
 0x153   : > { %1859 = vmatprep.subr.mxu0 %v2819_v36  ;;  %2138 = vmatprep.subr.mxu1 %v2870_v0  ;;  %v2891_v63 = vld [vmem:[%s4174_s2 + $0x700] sm:$0xff]  ;;  %v2889_v36 = vld [vmem:[%s4174_s2 + $0x6f8] sm:$0xff]  ;;  %v2024_v0 = vrot.slane %v3682_v30, 3 }
 0x154   : > { %1860 = vmatpush1.msra.mxu0 %v2818_v1  ;;  %2139 = vmatpush1.msra.mxu1 %v2869_v2  ;;  %v2888_v1 = vld [vmem:[%s4174_s2 + $0x6f0] sm:$0xff]  ;;  %v2303_v2 = vrot.slane %v3682_v30, 6 }
 0x155   : > { %1861 = vmatprep.subr.mxu0 %v2817_v3  ;;  %2140 = vmatprep.subr.mxu1 %v2868_v22  ;;  %v2887_v3 = vld [vmem:[%s4174_s2 + $0x6e8] sm:$0xff]  ;;  %v2886_v22 = vld [vmem:[%s4174_s2 + $0x6e0] sm:$0xff] }
 0x156   : > { %1862 = vmatpush1.msra.mxu0 %v2816_v4  ;;  %2141 = vmatpush1.msra.mxu1 %v2867_v5  ;;  %v2885_v4 = vld [vmem:[%s4174_s2 + $0x6d8] sm:$0xff]  ;;  %v2884_v5 = vld [vmem:[%s4174_s2 + $0x6d0] sm:$0xff] }
 0x157   : > { %1863 = vmatprep.subr.mxu0 %v2815_v6  ;;  %2142 = vmatprep.subr.mxu1 %v2866_v7  ;;  %v2883_v6 = vld [vmem:[%s4174_s2 + $0x6c8] sm:$0xff]  ;;  %v2882_v7 = vld [vmem:[%s4174_s2 + $0x6c0] sm:$0xff] }
 0x158   : > { %1864 = vmatpush1.msra.mxu0 %v2814_v24  ;;  %2143 = vmatpush1.msra.mxu1 %v2865_v8  ;;  %v2881_v24 = vld [vmem:[%s4174_s2 + $0x6b8] sm:$0xff]  ;;  %v2880_v8 = vld [vmem:[%s4174_s2 + $0x6b0] sm:$0xff] }
 0x159   : > { %1865 = vmatprep.subr.mxu0 %v2813_v12  ;;  %2144 = vmatprep.subr.mxu1 %v2864_v14  ;;  %v2879_v12 = vld [vmem:[%s4174_s2 + $0x6a8] sm:$0xff]  ;;  %v2878_v14 = vld [vmem:[%s4174_s2 + $0x6a0] sm:$0xff] }
 0x15a   : > { %1866 = vmatpush1.msra.mxu0 %v2812_v15  ;;  %2145 = vmatpush1.msra.mxu1 %v2863_v17  ;;  %v2877_v15 = vld [vmem:[%s4174_s2 + $0x698] sm:$0xff]  ;;  %v2876_v17 = vld [vmem:[%s4174_s2 + $0x690] sm:$0xff] }
 0x15b   : > { %1867 = vmatprep.subr.mxu0 %v2811_v19  ;;  %2146 = vmatprep.subr.mxu1 %v2862_v20  ;;  %v2875_v19 = vld [vmem:[%s4174_s2 + $0x688] sm:$0xff]  ;;  %v2874_v20 = vld [vmem:[%s4174_s2 + $0x680] sm:$0xff] }
 0x15c   : > { %1868 = vmatpush1.msra.mxu0 %v2810_v21  ;;  %2147 = vmatpush1.msra.mxu1 %v2861_v28  ;;  %v2923_v21 = vld [vmem:[%s4174_s2 + $0x7f8] sm:$0xff]  ;;  %v2210_v28 = vrot.slane %v3682_v30, 5 }
 0x15d   : > { %1869 = vmatprep.subr.mxu0 %v2809_v23  ;;  %2148 = vmatprep.subr.mxu1 %v2860_v25  ;;  %v2922_v23 = vld [vmem:[%s4174_s2 + $0x7f0] sm:$0xff]  ;;  %v2921_v25 = vld [vmem:[%s4174_s2 + $0x7e8] sm:$0xff] }
 0x15e   : > { %1870 = vmatpush1.msra.mxu0 %v2808_v26  ;;  %2149 = vmatpush1.msra.mxu1 %v2859_v27  ;;  %v2920_v26 = vld [vmem:[%s4174_s2 + $0x7e0] sm:$0xff]  ;;  %v2919_v27 = vld [vmem:[%s4174_s2 + $0x7d8] sm:$0xff] }
 0x15f   : > { %1871 = vmatprep.subr.mxu0 %v2807_v32  ;;  %2150 = vmatprep.subr.mxu1 %v2858_v29  ;;  %v2918_v32 = vld [vmem:[%s4174_s2 + $0x7d0] sm:$0xff]  ;;  %v2917_v29 = vld [vmem:[%s4174_s2 + $0x7c8] sm:$0xff] }
 0x160   : > { %1872 = vmatpush1.msra.mxu0 %v2806_v31  ;;  %1905 = vmatprep.mubr.f32.mxu0 %v3105_v9  ;;  %v2916_v31 = vld [vmem:[%s4174_s2 + $0x7c0] sm:$0xff] }
 0x161   : > { %2151 = vmatpush1.msra.mxu1 %v2857_v33  ;;  %2184 = vmatprep.mubr.f32.mxu1 %v3105_v9  ;;  %v2915_v33 = vld [vmem:[%s4174_s2 + $0x7b8] sm:$0xff] }
 0x162   : > { %2822 = vmatmul.mubr.msk.f32.vlgmr.msra.gmra.mxu0 %vm1023_vm1, %v1838_v35  ;;  %2043 = vmatprep.subr.mxu0 %v2855_v34  ;;  %v2914_v34 = vld [vmem:[%s4174_s2 + $0x7b0] sm:$0xff]  ;;  %v2913_v35 = vld [vmem:[%s4174_s2 + $0x7a8] sm:$0xff] }
 0x163   : > { %2873 = vmatmul.mubr.msk.f32.vlgmr.msra.gmra.mxu1 %vm1023_vm1, %v2117_v38  ;;  %2322 = vmatprep.subr.mxu1 %v2906_v37  ;;  %v2912_v37 = vld [vmem:[%s4174_s2 + $0x7a0] sm:$0xff]  ;;  %v2911_v38 = vld [vmem:[%s4174_s2 + $0x798] sm:$0xff] }
 0x164   : > { %2044 = vmatpush1.msra.mxu0 %v2854_v39  ;;  %2323 = vmatpush1.msra.mxu1 %v2905_v40  ;;  %v2910_v39 = vld [vmem:[%s4174_s2 + $0x790] sm:$0xff]  ;;  %v2909_v40 = vld [vmem:[%s4174_s2 + $0x788] sm:$0xff] }
 0x165   : > { %2045 = vmatprep.subr.mxu0 %v2853_v41  ;;  %2324 = vmatprep.subr.mxu1 %v2904_v42  ;;  %v2908_v41 = vld [vmem:[%s4174_s2 + $0x780] sm:$0xff]  ;;  %v2396_v42 = vrot.slane %v3682_v30, 7 }
 0x166   : > { %2046 = vmatpush1.msra.mxu0 %v2852_v43  ;;  %2325 = vmatpush1.msra.mxu1 %v2903_v44  ;;  %v2503_v43 = vld [vmem:[%s4176_s4 + $0x78] sm:$0xff]  ;;  %v2502_v44 = vld [vmem:[%s4176_s4 + $0x70] sm:$0xff]  ;;  %v2500_v30 = vld [vmem:[%s4176_s4 + $0x60] sm:$0xff] }
 0x167   : > { %2047 = vmatprep.subr.mxu0 %v2851_v45  ;;  %2326 = vmatprep.subr.mxu1 %v2902_v46  ;;  %v2501_v45 = vld [vmem:[%s4176_s4 + $0x68] sm:$0xff]  ;;  %v2499_v46 = vld [vmem:[%s4176_s4 + $0x58] sm:$0xff] }
 0x168   : > { %2048 = vmatpush1.msra.mxu0 %v2850_v10  ;;  %2327 = vmatpush1.msra.mxu1 %v2901_v11  ;;  %v2498_v10 = vld [vmem:[%s4176_s4 + $0x50] sm:$0xff]  ;;  %v2497_v11 = vld [vmem:[%s4176_s4 + $0x48] sm:$0xff] }
 0x169   : > { %2049 = vmatprep.subr.mxu0 %v2849_v47  ;;  %2328 = vmatprep.subr.mxu1 %v2900_v48  ;;  %v2496_v47 = vld [vmem:[%s4176_s4 + $0x40] sm:$0xff]  ;;  %v2495_v48 = vld [vmem:[%s4176_s4 + $0x38] sm:$0xff] }
 0x16a   : > { %2050 = vmatpush1.msra.mxu0 %v2848_v49  ;;  %2329 = vmatpush1.msra.mxu1 %v2899_v13  ;;  %v2494_v49 = vld [vmem:[%s4176_s4 + $0x30] sm:$0xff]  ;;  %v2493_v13 = vld [vmem:[%s4176_s4 + $0x28] sm:$0xff] }
 0x16b   : > { %2051 = vmatprep.subr.mxu0 %v2847_v50  ;;  %2330 = vmatprep.subr.mxu1 %v2898_v51  ;;  %v2492_v50 = vld [vmem:[%s4176_s4 + $0x20] sm:$0xff]  ;;  %v2491_v51 = vld [vmem:[%s4176_s4 + $0x18] sm:$0xff] }
 0x16c   : > { %2052 = vmatpush1.msra.mxu0 %v2846_v52  ;;  %2331 = vmatpush1.msra.mxu1 %v2897_v53  ;;  %v2490_v52 = vld [vmem:[%s4176_s4 + $0x10] sm:$0xff]  ;;  %v2489_v53 = vld [vmem:[%s4176_s4 + $0x8] sm:$0xff] }
 0x16d   : > { %2053 = vmatprep.subr.mxu0 %v2845_v54  ;;  %2332 = vmatprep.subr.mxu1 %v2896_v16  ;;  %v2488_v54 = vld [vmem:[%s4176_s4] sm:$0xff]  ;;  %v2505_v16 = vld [vmem:[%s4176_s4 + $0x88] sm:$0xff] }
 0x16e   : > { %2054 = vmatpush1.msra.mxu0 %v2844_v55  ;;  %2333 = vmatpush1.msra.mxu1 %v2895_v56  ;;  %v2504_v55 = vld [vmem:[%s4176_s4 + $0x80] sm:$0xff] }
 0x16f   : > { %2055 = vmatprep.subr.mxu0 %v2843_v57  ;;  %2334 = vmatprep.subr.mxu1 %v2894_v58  ;;  %v2506_v56 = vld [vmem:[#allocation2] sm:$0x1]  ;;  %v3106_v57 = vmov 0  }
 0x170   : > { %2056 = vmatpush1.msra.mxu0 %v2842_v59  ;;  %2335 = vmatpush1.msra.mxu1 %v2893_v18 }
 0x171   : > { %2057 = vmatprep.subr.mxu0 %v2841_v60  ;;  %2336 = vmatprep.subr.mxu1 %v2892_v61 }
 0x172   : > { %2058 = vmatpush1.msra.mxu0 %v2840_v62  ;;  %2091 = vmatprep.mubr.f32.mxu0 %v3105_v9 }
 0x173   : > { %2337 = vmatpush1.msra.mxu1 %v2891_v63  ;;  %2370 = vmatprep.mubr.f32.mxu1 %v3105_v9 }
 0x174   : > { %2856 = vmatmul.mubr.msk.f32.vlgmr.msra.gmra.mxu0 %vm1023_vm1, %v2024_v0  ;;  %2229 = vmatprep.subr.mxu0 %v2889_v36 }
 0x175   : > { %2907 = vmatmul.mubr.msk.f32.vlgmr.msra.gmra.mxu1 %vm1023_vm1, %v2303_v2  ;;  %2230 = vmatpush1.msra.mxu0 %v2888_v1 }
 0x176   : > { %2231 = vmatprep.subr.mxu0 %v2887_v3  ;;  %2277 = vmatprep.mubr.f32.mxu0 %v3105_v9 }
 0x177   : > { %2232 = vmatpush1.msra.mxu0 %v2886_v22  ;;  %2520 = vmatprep.subr.mxu1 %v3105_v9 }
 0x178   : > { %2233 = vmatprep.subr.mxu0 %v2885_v4  ;;  %2521 = vmatpush1.msra.mxu1 %v2503_v43 }
 0x179   : > { %2234 = vmatpush1.msra.mxu0 %v2884_v5  ;;  %2522 = vmatprep.subr.mxu1 %v3105_v9 }
 0x17a   : > { %2235 = vmatprep.subr.mxu0 %v2883_v6  ;;  %2523 = vmatpush1.msra.mxu1 %v2502_v44 }
 0x17b   : > { %2236 = vmatpush1.msra.mxu0 %v2882_v7  ;;  %2524 = vmatprep.subr.mxu1 %v3105_v9 }
 0x17c   : > { %2237 = vmatprep.subr.mxu0 %v2881_v24  ;;  %2525 = vmatpush1.msra.mxu1 %v2501_v45 }
 0x17d   : > { %2238 = vmatpush1.msra.mxu0 %v2880_v8  ;;  %2526 = vmatprep.subr.mxu1 %v3105_v9 }
 0x17e   : > { %2239 = vmatprep.subr.mxu0 %v2879_v12  ;;  %2527 = vmatpush1.msra.mxu1 %v2500_v30 }
 0x17f   : > { %2240 = vmatpush1.msra.mxu0 %v2878_v14  ;;  %2528 = vmatprep.subr.mxu1 %v3105_v9 }
 0x180   : > { %2241 = vmatprep.subr.mxu0 %v2877_v15  ;;  %2529 = vmatpush1.msra.mxu1 %v2499_v46 }
 0x181   : > { %2242 = vmatpush1.msra.mxu0 %v2876_v17  ;;  %2530 = vmatprep.subr.mxu1 %v3105_v9 }
 0x182   : > { %2243 = vmatprep.subr.mxu0 %v2875_v19  ;;  %2531 = vmatpush1.msra.mxu1 %v2498_v10 }
 0x183   : > { %2244 = vmatpush1.msra.mxu0 %v2874_v20  ;;  %2532 = vmatprep.subr.mxu1 %v3105_v9 }
 0x184   : > { %2890 = vmatmul.mubr.msk.f32.vlgmr.msra.gmra.mxu0 %vm1023_vm1, %v2210_v28  ;;  %2415 = vmatprep.subr.mxu0 %v2923_v21 }
 0x185   : > { %2416 = vmatpush1.msra.mxu0 %v2922_v23  ;;  %2463 = vmatprep.mubr.f32.mxu0 %v3105_v9 }
 0x186   : > { %2417 = vmatprep.subr.mxu0 %v2921_v25  ;;  %2533 = vmatpush1.msra.mxu1 %v2497_v11 }
 0x187   : > { %2418 = vmatpush1.msra.mxu0 %v2920_v26  ;;  %2534 = vmatprep.subr.mxu1 %v3105_v9 }
 0x188   : > { %2419 = vmatprep.subr.mxu0 %v2919_v27  ;;  %2535 = vmatpush1.msra.mxu1 %v2496_v47 }
 0x189   : > { %2420 = vmatpush1.msra.mxu0 %v2918_v32  ;;  %2536 = vmatprep.subr.mxu1 %v3105_v9 }
 0x18a   : > { %2421 = vmatprep.subr.mxu0 %v2917_v29  ;;  %2537 = vmatpush1.msra.mxu1 %v2495_v48 }
 0x18b   : > { %2422 = vmatpush1.msra.mxu0 %v2916_v31  ;;  %2538 = vmatprep.subr.mxu1 %v3105_v9 }
 0x18c   : > { %2423 = vmatprep.subr.mxu0 %v2915_v33  ;;  %2539 = vmatpush1.msra.mxu1 %v2494_v49 }
 0x18d   : > { %2424 = vmatpush1.msra.mxu0 %v2914_v34  ;;  %2540 = vmatprep.subr.mxu1 %v3105_v9 }
 0x18e   : > { %2425 = vmatprep.subr.mxu0 %v2913_v35  ;;  %2541 = vmatpush1.msra.mxu1 %v2493_v13 }
 0x18f   : > { %2426 = vmatpush1.msra.mxu0 %v2912_v37  ;;  %2542 = vmatprep.subr.mxu1 %v3105_v9 }
 0x190   : > { %2427 = vmatprep.subr.mxu0 %v2911_v38  ;;  %2543 = vmatpush1.msra.mxu1 %v2492_v50 }
 0x191   : > { %2428 = vmatpush1.msra.mxu0 %v2910_v39  ;;  %2544 = vmatprep.subr.mxu1 %v3105_v9 }
 0x192   : > { %2429 = vmatprep.subr.mxu0 %v2909_v40  ;;  %2545 = vmatpush1.msra.mxu1 %v2491_v51 }
 0x193   : > { %2430 = vmatpush1.msra.mxu0 %v2908_v41  ;;  %2546 = vmatprep.subr.mxu1 %v3105_v9 }
 0x194   : > { %2924 = vmatmul.mubr.msk.f32.vlgmr.msra.gmra.mxu0 %vm1023_vm1, %v2396_v42  ;;  %2547 = vmatpush1.msra.mxu1 %v2490_v52  ;;  %v2474_v42 = vlaneseq }
 0x195   : > { %2548 = vmatprep.subr.mxu1 %v3105_v9  ;;  %3092 = vset.pattern.permute.xlu0 %v3106_v57 }
 0x196   : > { %2549 = vmatpush1.msra.mxu1 %v2489_v53  ;;  %2509 = vperm.xlu0 %3092, %v2506_v56   ;;  %v2475_v10 = vshrl.u32 %v2474_v42, 7  ;;  %v2472_v53 = vld [vmem:[%s4175_s3] sm:$0x3] }
 0x197   : > { %2550 = vmatprep.subr.mxu1 %v3105_v9 }
 0x198   : > { %2551 = vmatpush1.msra.mxu1 %v2488_v54  ;;  %v2476_v51 = vsub.s32 0, %v2475_v10  ;;  %v2480_v54 = vsub.s32 1, %v2475_v10 }
 0x199   : > { %2580 = vmatprep.subr.mxu1 %v3105_v9 }
 0x19a   : > { %2581 = vmatpush2.msra.mxu1 %v2505_v16  ;;  %v2477_v57 = vrot.slane %v2472_v53, %v2476_v51 }
 0x19b   : > { %2582 = vmatprep.subr.mxu1 %v3105_v9 }
 0x19c   : > { %2583 = vmatpush2.msra.mxu1 %v2504_v55 }
 0x1c9   : > { %v1092_v58 = vpop.f32.mrf.mxu0  ;;  %v1256_v62 = vpop.f32.mrf.mxu1 }
 0x1cb   : > { %v1094_v59 = vpop.f32.mrf.mxu0  ;;  %v1258_v1 = vpop.f32.mrf.mxu1 }
 0x1da   : > { %v1165_v18 = vpop.f32.mrf.mxu0 }
 0x1db   : > { %v1166_v61 = vadd.f32 %v1165_v18, %v1092_v58  ;;  %v1442_v4 = vpop.f32.mrf.mxu1  ;;  %v2481_v18 = vrot.slane %v2472_v53, %v2480_v54 }
 0x1dc   : > { %v1167_v60 = vpop.f32.mrf.mxu0 }
 0x1dd   : > { %v1168_v36 = vadd.f32 %v1167_v60, %v1094_v59  ;;  %v1261_v0 = vadd.f32 %v1256_v62, %v1166_v61  ;;  %v1444_v7 = vpop.f32.mrf.mxu1 }
 0x1df   : > { %v1262_v22 = vadd.f32 %v1258_v1, %v1168_v36 }
 0x1ec   : > { %v1349_v63 = vpop.f32.mrf.mxu0 }
 0x1ed   : > { %v1354_v3 = vadd.f32 %v1349_v63, %v1261_v0  ;;  %v1628_v14 = vpop.f32.mrf.mxu1 }
 0x1ee   : > { %v1351_v2 = vpop.f32.mrf.mxu0 }
 0x1ef   : > { %v1355_v5 = vadd.f32 %v1351_v2, %v1262_v22  ;;  %v1447_v6 = vadd.f32 %v1442_v4, %v1354_v3  ;;  %v1630_v20 = vpop.f32.mrf.mxu1 }
 0x1f1   : > { %v1448_v12 = vadd.f32 %v1444_v7, %v1355_v5 }
 0x1fe   : > { %v1535_v9 = vpop.f32.mrf.mxu0 }
 0x1ff   : > { %v1540_v8 = vadd.f32 %v1535_v9, %v1447_v6  ;;  %v1814_v25 = vpop.f32.mrf.mxu1 }
 0x200   : > { %v1537_v24 = vpop.f32.mrf.mxu0 }
 0x201   : > { %v1541_v17 = vadd.f32 %v1537_v24, %v1448_v12  ;;  %v1633_v19 = vadd.f32 %v1628_v14, %v1540_v8  ;;  %v1816_v29 = vpop.f32.mrf.mxu1 }
 0x203   : > { %v1634_v23 = vadd.f32 %v1630_v20, %v1541_v17 }
 0x210   : > { %v1721_v15 = vpop.f32.mrf.mxu0 }
 0x211   : > { %v1726_v28 = vadd.f32 %v1721_v15, %v1633_v19  ;;  %v2000_v35 = vpop.f32.mrf.mxu1  ;;  %v2510_v1 = vpop.permute.xlu0 %2509 }
 0x212   : > { %v1723_v21 = vpop.f32.mrf.mxu0  ;;  %v2515_v2 = vrot.slane %v2510_v1, %v2476_v51 }
 0x213   : > { %v1727_v27 = vadd.f32 %v1723_v21, %v1634_v23  ;;  %v1819_v32 = vadd.f32 %v1814_v25, %v1726_v28  ;;  %v2002_v40 = vpop.f32.mrf.mxu1 }
 0x215   : > { %v1820_v34 = vadd.f32 %v1816_v29, %v1727_v27 }
 0x222   : > { %v1907_v26 = vpop.f32.mrf.mxu0 }
 0x223   : > { %v1912_v33 = vadd.f32 %v1907_v26, %v1819_v32  ;;  %v2186_v45 = vpop.f32.mrf.mxu1 }
 0x224   : > { %v1909_v31 = vpop.f32.mrf.mxu0 }
 0x225   : > { %v1913_v38 = vadd.f32 %v1909_v31, %v1820_v34  ;;  %v2005_v39 = vadd.f32 %v2000_v35, %v1912_v33  ;;  %v2188_v47 = vpop.f32.mrf.mxu1 }
 0x227   : > { %v2006_v44 = vadd.f32 %v2002_v40, %v1913_v38 }
 0x234   : > { %v2093_v37 = vpop.f32.mrf.mxu0 }
 0x235   : > { %v2098_v43 = vadd.f32 %v2093_v37, %v2005_v39  ;;  %v2372_v50 = vpop.f32.mrf.mxu1 }
 0x236   : > { %v2095_v41 = vpop.f32.mrf.mxu0 }
 0x237   : > { %v2099_v46 = vadd.f32 %v2095_v41, %v2006_v44  ;;  %v2191_v11 = vadd.f32 %v2186_v45, %v2098_v43  ;;  %v2374_v55 = vpop.f32.mrf.mxu1 }
 0x239   : > { %v2192_v13 = vadd.f32 %v2188_v47, %v2099_v46 }
 0x244   : > { %v2279_v30 = vpop.f32.mrf.mxu0 }
 0x245   : > { %v2284_v49 = vadd.f32 %v2279_v30, %v2191_v11 }
 0x246   : > { %v2281_v48 = vpop.f32.mrf.mxu0 }
 0x247   : > { %v2285_v52 = vadd.f32 %v2281_v48, %v2192_v13  ;;  %v2377_v16 = vadd.f32 %v2372_v50, %v2284_v49 }
 0x249   : > { %v2378_v59 = vadd.f32 %v2374_v55, %v2285_v52 }
 0x254   : > { %v2465_v56 = vpop.f32.mrf.mxu0 }
 0x255   : > { %v2470_v58 = vadd.f32 %v2465_v56, %v2377_v16 }
 0x256   : > { %v2467_v60 = vpop.f32.mrf.mxu0 }
 0x257   : > { %v2471_v61 = vadd.f32 %v2467_v60, %v2378_v59  ;;  %v2484_v62 = vadd.f32 %v2477_v57, %v2470_v58 }
 0x259   : > { %v2485_v63 = vadd.f32 %v2481_v18, %v2471_v61  ;;  %v2486_v0 = vmax.f32 %v2484_v62, 0.0 }
 0x25b   : > { %v2487_v36 = vmax.f32 %v2485_v63, 0.0 }
 0x25d   : > { %2925 = vmatprep.mubr.msk.f32.mxu1 %vm2516_vm2, %v2487_v36 }
 0x25e   : > { %2585 = vmatmul.mubr.f32.vlgmr.msra.gmra.mxu1 %v2486_v0 }
 0x31e   : > { %v2586_v3 = vpop.f32.mrf.mxu1 }
 0x31f   : > { %v2587_v22 = vadd.f32 %v2586_v3, %v2515_v2 }
 0x320   : > { %v2588_v4 = vpop.f32.mrf.mxu1 }
 0x321   : > { %v2590_v9 = vsub.f32 0.0, %v2587_v22 }
 0x323   : > { %v2591_v5 = vmul.f32 1.442695, %v2590_v9 }
 0x325   : > { %3093 = vpow2.f32 %v2591_v5 }
 0x332   : > { %v3094_v6 = vpop.eup %3093 }
 0x333   : > { %v2593_v7 = vadd.f32 1.0, %v3094_v6 }
 0x335   : > { %3095 = vrcp.f32 %v2593_v7 }
 0x342   : > { %v3096_v24 = vpop.eup %3095 }
 0x343   : > { %2597 = vst.msk [vmem:[%s249_s8] sm:$0x1] %vm2596_vm3, %v3096_v24 }
 0x344 PF: > { %s18_s23 = sadd.s32 1, %s3103_s23  }
 0x345   : > { %p15_p4 = scmp.ge.s32.totalorder %s18_s23, 4  }
 0x347   :  { %17 = sbr.rel (!%p15_p4) target bundleno = 3 (0x3), region = 89 }

</bundles_post_ra>
